<compile_context>
chip_gen: v7x
topology: tpu7x:2x2x1
jax: 0.10.0
libtpu: 0.0.40
codegen_flags: <defaults>
</compile_context>

<pallas_src>
import math

import jax
import jax.numpy as jnp
import numpy as np
from jax.experimental import pallas as pl
from jax.experimental.pallas import tpu as pltpu


def _round_up(v, m):
    return ((v + m - 1) // m) * m


def _sigmoid(z):
    # exact sigmoid; exp lands on the EUP, the divide is negligible at these sizes
    return 1.0 / (1.0 + jnp.exp(-z))


# ---------------------------------------------------------------------------
# Fused kernel: RGCN (3 graph convs) + layer-weighted sum + node aggregation
#               + node_mean_net loss + edge_mean_net loss, one batch block
#               per grid step.
# ---------------------------------------------------------------------------
def fused_kernel(x_ref, adj_ref,
                 gc1_ref, gc2_ref, gc3_ref, lw_ref,
                 nm_w1_ref, nm_b1_ref, nm_w2_ref, nm_b2_ref,
                 em_w1_ref, em_b1_ref, em_w2_ref, em_b2_ref,
                 node_out_ref, edge_out_ref):
    x = x_ref[...]                      # (Bb, N, D)  f32 (binary)
    adj = adj_ref[...]                  # (Bb, N, N)  f32 (binary)
    Bb, N, D = x.shape
    H = gc1_ref.shape[1]

    def adj_apply(s3):
        # adj @ s per sample, done as N unrolled VPU FMAs instead of Bb tiny
        # MXU matmuls: acc[b,i,:] = sum_j adj[b,i,j] * s[b,j,:]
        acc = adj[:, :, 0:1] * s3[:, 0:1, :]
        for j in range(1, N):
            acc = acc + adj[:, :, j:j + 1] * s3[:, j:j + 1, :]
        return acc

    # ---- RGCN: feature matmuls flattened over the block (MXU, bf16 operands) ----
    x_bf = x.astype(jnp.bfloat16)
    s1 = jnp.dot(x_bf.reshape(Bb * N, D), gc1_ref[...],
                 preferred_element_type=jnp.float32).reshape(Bb, N, H)
    x1 = jnp.maximum(adj_apply(s1), 0.0)

    lw0 = lw_ref[0, 0]
    lw1 = lw_ref[0, 1]
    lw2 = lw_ref[0, 2]
    emb = lw0 * x1                                   # incremental accumulation

    s2 = jnp.dot(x1.astype(jnp.bfloat16).reshape(Bb * N, H), gc2_ref[...],
                 preferred_element_type=jnp.float32).reshape(Bb, N, H)
    x2 = jnp.maximum(adj_apply(s2), 0.0)
    emb = emb + lw1 * x2

    s3 = jnp.dot(x2.astype(jnp.bfloat16).reshape(Bb * N, H), gc3_ref[...],
                 preferred_element_type=jnp.float32).reshape(Bb, N, H)
    x3 = adj_apply(s3)
    emb = emb + lw2 * x3                             # (Bb, N, H) f32

    agg = jnp.sum(emb, axis=1)                       # (Bb, H)
    agg_bf = agg.astype(jnp.bfloat16)

    # ---- node_mean_net (ST_Net_Sigmoid) + node loss ----
    h_n = jnp.tanh(jnp.dot(agg_bf, nm_w1_ref[...],
                           preferred_element_type=jnp.float32) + nm_b1_ref[...])
    z_n = jnp.dot(h_n.astype(jnp.bfloat16), nm_w2_ref[...],
                  preferred_element_type=jnp.float32) + nm_b2_ref[...]
    node_mean = _sigmoid(z_n)                        # (Bb, D)
    x0 = x[:, 0, :]                                  # (Bb, D), binary
    node_probs = x0 * node_mean + (1.0 - x0) * (1.0 - node_mean) + 1e-8
    node_loss = jnp.sum(-jnp.log(node_probs), axis=1)          # (Bb,)

    # ---- edge_mean_net over all graph positions, lane-major (Bb, N) ----
    # edge_embedding_i = [agg, emb[:,0,:], emb[:,i,:]]; linear1 split into 3 blocks.
    w1 = em_w1_ref[...]                              # (3H, H) bf16
    w1a = w1[0:H, :]
    w1b = w1[H:2 * H, :]
    w1c = w1[2 * H:3 * H, :]
    emb0 = emb[:, 0, :]                              # (Bb, H)
    base = (jnp.dot(agg_bf, w1a, preferred_element_type=jnp.float32)
            + jnp.dot(emb0.astype(jnp.bfloat16), w1b, preferred_element_type=jnp.float32)
            + em_b1_ref[...])                        # (Bb, H)
    pre = (jnp.dot(emb.astype(jnp.bfloat16).reshape(Bb * N, H), w1c,
                   preferred_element_type=jnp.float32).reshape(Bb, N, H)
           + base[:, None, :])                       # (Bb, N, H)
    h_e = jnp.tanh(pre)
    w2_row = em_w2_ref[...]                          # (1, H) f32  (torch: out=1, in=H)
    edge_logit = jnp.sum(h_e * w2_row[None, :, :], axis=-1) + em_b2_ref[...]   # (Bb, N)
    edge_mean = _sigmoid(edge_logit)

    adj_row = adj[:, 0, :]                           # (Bb, N), binary, lane-major
    edge_probs = adj_row * edge_mean + (1.0 - adj_row) * (1.0 - edge_mean) + 1e-8
    edge_loss = jnp.sum(-jnp.log(edge_probs), axis=1)           # (Bb,)

    # Lane-dense (1, Bblk) stores.
    node_out_ref[...] = node_loss[None, :]
    edge_out_ref[...] = edge_loss[None, :]


# ---------------------------------------------------------------------------
# Wrapper
# ---------------------------------------------------------------------------
def net_model_forward(params, x, adj, x_deq=None, adj_deq=None):
    # x_deq / adj_deq are unused by the reference forward (only referenced in
    # commented-out code); accepted for signature fidelity.
    B, N, D = x.shape
    H = params["gc1_w"].shape[1]

    # Batch-block size:
    #   * B <= 128 : whole batch in one block.
    #   * B <= 1024: two 128-aligned blocks -> both v7x TensorCores busy.
    #   * larger   : 512-sample blocks (amortizes ~0.35us/step, lane-dense output,
    #                intermediates stay far under the VMEM limit).
    # Last block may be ragged: Pallas pads boundary blocks; the garbage rows
    # only produce garbage losses in lanes that are sliced off below.
    if B <= 128:
        Bblk = B
    elif B <= 1024:
        Bblk = _round_up(pl.cdiv(B, 2), 128)
    else:
        Bblk = 512
    nblk = pl.cdiv(B, Bblk)
    B_out = nblk * Bblk

    # Cast matmul weights to bf16 once (MXU operands); biases / elementwise
    # params stay f32 so VPU math is f32 on every generation (incl. v5e).
    gc1_w = params["gc1_w"].astype(jnp.bfloat16)
    gc2_w = params["gc2_w"].astype(jnp.bfloat16)
    gc3_w = params["gc3_w"].astype(jnp.bfloat16)
    nm_w1 = params["nm_w1"].astype(jnp.bfloat16)
    nm_w2 = params["nm_w2"].astype(jnp.bfloat16)
    em_w1 = params["em_w1"].astype(jnp.bfloat16)

    const2 = lambda b: (0, 0)

    node_out, edge_out = pl.pallas_call(
        fused_kernel,
        out_shape=(jax.ShapeDtypeStruct((1, B_out), jnp.float32),
                   jax.ShapeDtypeStruct((1, B_out), jnp.float32)),
        grid=(nblk,),
        in_specs=[
            pl.BlockSpec((Bblk, N, D), lambda b: (b, 0, 0)),
            pl.BlockSpec((Bblk, N, N), lambda b: (b, 0, 0)),
            pl.BlockSpec((D, H), const2),                            # gc1_w (bf16)
            pl.BlockSpec((H, H), const2),                            # gc2_w (bf16)
            pl.BlockSpec((H, H), const2),                            # gc3_w (bf16)
            pl.BlockSpec(memory_space=pltpu.MemorySpace.SMEM),       # layer_w (1,3)
            pl.BlockSpec((H, H), const2),                            # nm_w1 (bf16)
            pl.BlockSpec((1, H), const2),                            # nm_b1
            pl.BlockSpec((H, D), const2),                            # nm_w2 (bf16)
            pl.BlockSpec((1, D), const2),                            # nm_b2
            pl.BlockSpec((3 * H, H), const2),                        # em_w1 (bf16)
            pl.BlockSpec((1, H), const2),                            # em_b1
            pl.BlockSpec((1, H), const2),                            # em_w2
            pl.BlockSpec((1, 1), const2),                            # em_b2
        ],
        out_specs=(pl.BlockSpec((1, Bblk), lambda b: (0, b)),
                   pl.BlockSpec((1, Bblk), lambda b: (0, b))),
        compiler_params=pltpu.CompilerParams(
            dimension_semantics=("parallel",),
            vmem_limit_bytes=48 * 1024 * 1024),
    )(x, adj,
      gc1_w, gc2_w, gc3_w, params["layer_w"],
      nm_w1, params["nm_b1"], nm_w2, params["nm_b2"],
      em_w1, params["em_b1"], params["em_w2"], params["em_b2"])

    # TODO(synk): edge_var_net / node_cov_net are evaluated in the PyTorch
    # forward but their results never feed the returned losses; the dead
    # compute is skipped here.
    node_loss = node_out.reshape(B_out)[:B]
    edge_loss = edge_out.reshape(B_out)[:B]
    return node_loss, edge_loss


# ---------------------------------------------------------------------------
# Pure-JAX f32 reference (mirrors the PyTorch forward) for correctness checking.
# ---------------------------------------------------------------------------
def reference_forward(params, x, adj):
    B, N, D = x.shape
    H = params["gc1_w"].shape[1]

    def gcn(h, w, relu):
        s = jnp.einsum("bid,dh->bih", h, w)
        o = jnp.einsum("bij,bjh->bih", adj, s)
        return jnp.maximum(o, 0.0) if relu else o

    x1 = gcn(x, params["gc1_w"], True)
    x2 = gcn(x1, params["gc2_w"], True)
    x3 = gcn(x2, params["gc3_w"], False)
    lw = params["layer_w"]
    emb = lw[0, 0] * x1 + lw[0, 1] * x2 + lw[0, 2] * x3
    agg = emb.sum(axis=1)

    h = jnp.tanh(agg @ params["nm_w1"] + params["nm_b1"])
    node_mean = jax.nn.sigmoid(h @ params["nm_w2"] + params["nm_b2"])
    x0 = x[:, 0, :]
    node_probs = jnp.where(x0 == 1.0, node_mean,
                           jnp.where(x0 == 0.0, 1.0 - node_mean, 0.0)) + 1e-8
    node_loss = (-jnp.log(node_probs)).sum(axis=1)

    emb0 = emb[:, 0, :]
    edge_emb = jnp.concatenate(
        [jnp.broadcast_to(agg[:, None, :], (B, N, H)),
         jnp.broadcast_to(emb0[:, None, :], (B, N, H)),
         emb], axis=2)                                           # (B, N, 3H)
    eh = jnp.tanh(jnp.einsum("bnf,fh->bnh", edge_emb, params["em_w1"]) + params["em_b1"])
    edge_logit = jnp.einsum("bnh,oh->bno", eh, params["em_w2"])[..., 0] + params["em_b2"][0, 0]
    edge_mean = jax.nn.sigmoid(edge_logit)
    a = adj[:, 0, :]
    edge_probs = jnp.where(a == 1.0, edge_mean,
                           jnp.where(a == 0.0, 1.0 - edge_mean, 0.0)) + 1e-8
    edge_loss = (-jnp.log(edge_probs)).sum(axis=1)
    return node_loss, edge_loss


if __name__ == "__main__":
    # small shapes: batch=2, graph_size N=8, node_dim=4, nhid=nout=32
    B, N, D, H = 2, 8, 4, 32

    key = jax.random.PRNGKey(0)
    ks = jax.random.split(key, 12)

    def xavier(k, fan_in, fan_out):
        bound = math.sqrt(6.0 / (fan_in + fan_out))
        return jax.random.uniform(k, (fan_in, fan_out), jnp.float32, -bound, bound)

    # NOTE: torch initializes the second-layer ST-net weights to constant 1e-10;
    # random values are used here so the correctness check exercises the full
    # matmul/sigmoid path (the forward semantics are parameter-independent).
    params = {
        # RGCN graph conv weights (gcn_bias=False); stored (in, out) so x @ W.
        "gc1_w": xavier(ks[0], D, H),
        "gc2_w": xavier(ks[1], H, H),
        "gc3_w": xavier(ks[2], H, H),
        # torch leaves layer_weights uninitialized; use a deterministic value.
        "layer_w": jax.random.uniform(ks[3], (1, 3), jnp.float32, -1.0, 1.0),
        # node_mean_net[0]: ST_Net_Sigmoid(emb_size=H -> node_dim=D, hid=H)
        "nm_w1": xavier(ks[4], H, H),
        "nm_b1": jnp.zeros((1, H), jnp.float32),
        "nm_w2": xavier(ks[5], H, D),
        "nm_b2": jnp.zeros((1, D), jnp.float32),
        # edge_mean_net[0]: ST_Net_Sigmoid(3*emb_size -> 1, hid=H)
        "em_w1": xavier(ks[6], 3 * H, H),
        "em_b1": jnp.zeros((1, H), jnp.float32),
        "em_w2": xavier(ks[7], 1, H),        # torch layout (out=1, in=H)
        "em_b2": jnp.zeros((1, 1), jnp.float32),
    }

    x = jax.random.bernoulli(ks[8], 0.5, (B, N, D)).astype(jnp.float32)
    adj = jax.random.bernoulli(ks[9], 0.5, (B, N, N)).astype(jnp.float32)
    x_deq = jax.random.normal(ks[10], (B, N, D), jnp.float32)     # unused by forward
    adj_deq = jax.random.normal(ks[11], (B, N, N), jnp.float32)   # unused by forward

    node_loss, edge_loss = net_model_forward(params, x, adj, x_deq, adj_deq)
    jax.block_until_ready((node_loss, edge_loss))

    ref_node, ref_edge = reference_forward(params, x, adj)
    assert node_loss.shape == (B,) and edge_loss.shape == (B,)
    # bf16 MXU operands => compare against the f32 reference with a bf16-level
    # tolerance (errors stay well under this at these shapes).
    assert np.allclose(np.asarray(node_loss), np.asarray(ref_node), rtol=5e-2, atol=5e-2)
    assert np.allclose(np.asarray(edge_loss), np.asarray(ref_edge), rtol=5e-2, atol=5e-2)

    print("KERNEL_OK")
</pallas_src>

<mosaic_0001>
module attributes {stable_mosaic.version = 11 : i64} {
  func.func @fused_kernel(%arg0: i32, %arg1: memref<2x8x4xf32, #tpu.memory_space<vmem>>, %arg2: memref<2x8x8xf32, #tpu.memory_space<vmem>>, %arg3: memref<4x32xbf16, #tpu.memory_space<vmem>>, %arg4: memref<32x32xbf16, #tpu.memory_space<vmem>>, %arg5: memref<32x32xbf16, #tpu.memory_space<vmem>>, %arg6: memref<1x3xf32, #tpu.memory_space<smem>>, %arg7: memref<32x32xbf16, #tpu.memory_space<vmem>>, %arg8: memref<1x32xf32, #tpu.memory_space<vmem>>, %arg9: memref<32x4xbf16, #tpu.memory_space<vmem>>, %arg10: memref<1x4xf32, #tpu.memory_space<vmem>>, %arg11: memref<96x32xbf16, #tpu.memory_space<vmem>>, %arg12: memref<1x32xf32, #tpu.memory_space<vmem>>, %arg13: memref<1x32xf32, #tpu.memory_space<vmem>>, %arg14: memref<1x1xf32, #tpu.memory_space<vmem>>, %arg15: memref<1x2xf32, #tpu.memory_space<vmem>>, %arg16: memref<1x2xf32, #tpu.memory_space<vmem>>) attributes {dimension_semantics = [#tpu.dimension_semantics<parallel>], iteration_bounds = array<i64: 1>, scalar_prefetch = 0 : i64, scratch_operands = 0 : i64, tpu.core_type = #tpu.core_type<tc>, window_params = [{transform_indices = @transform_0, window_bounds = array<i64: 2, 8, 4>}, {transform_indices = @transform_1, window_bounds = array<i64: 2, 8, 8>}, {pipeline_mode = #tpu.pipeline_mode<synchronous>, transform_indices = @transform_2, window_bounds = array<i64: 4, 32>}, {pipeline_mode = #tpu.pipeline_mode<synchronous>, transform_indices = @transform_3, window_bounds = array<i64: 32, 32>}, {pipeline_mode = #tpu.pipeline_mode<synchronous>, transform_indices = @transform_4, window_bounds = array<i64: 32, 32>}, {transform_indices = @transform_5, window_bounds = array<i64: 1, 3>}, {pipeline_mode = #tpu.pipeline_mode<synchronous>, transform_indices = @transform_6, window_bounds = array<i64: 32, 32>}, {pipeline_mode = #tpu.pipeline_mode<synchronous>, transform_indices = @transform_7, window_bounds = array<i64: 1, 32>}, {pipeline_mode = #tpu.pipeline_mode<synchronous>, transform_indices = @transform_8, window_bounds = array<i64: 32, 4>}, {pipeline_mode = #tpu.pipeline_mode<synchronous>, transform_indices = @transform_9, window_bounds = array<i64: 1, 4>}, {pipeline_mode = #tpu.pipeline_mode<synchronous>, transform_indices = @transform_10, window_bounds = array<i64: 96, 32>}, {pipeline_mode = #tpu.pipeline_mode<synchronous>, transform_indices = @transform_11, window_bounds = array<i64: 1, 32>}, {pipeline_mode = #tpu.pipeline_mode<synchronous>, transform_indices = @transform_12, window_bounds = array<i64: 1, 32>}, {pipeline_mode = #tpu.pipeline_mode<synchronous>, transform_indices = @transform_13, window_bounds = array<i64: 1, 1>}, {transform_indices = @transform_14, window_bounds = array<i64: 1, 2>}, {transform_indices = @transform_15, window_bounds = array<i64: 1, 2>}]} {
    %c0 = arith.constant 0 : index
    %c0_0 = arith.constant 0 : index
    %c0_1 = arith.constant 0 : index
    %0 = vector.load %arg1[%c0, %c0_0, %c0_1] : memref<2x8x4xf32, #tpu.memory_space<vmem>>, vector<2x8x4xf32>
    %c0_2 = arith.constant 0 : index
    %c0_3 = arith.constant 0 : index
    %c0_4 = arith.constant 0 : index
    %1 = vector.load %arg2[%c0_2, %c0_3, %c0_4] : memref<2x8x8xf32, #tpu.memory_space<vmem>>, vector<2x8x8xf32>
    %2 = arith.truncf %0 : vector<2x8x4xf32> to vector<2x8x4xbf16>
    %3 = vector.shape_cast %2 : vector<2x8x4xbf16> to vector<16x4xbf16>
    %c0_5 = arith.constant 0 : index
    %c0_6 = arith.constant 0 : index
    %4 = vector.load %arg3[%c0_5, %c0_6] : memref<4x32xbf16, #tpu.memory_space<vmem>>, vector<4x32xbf16>
    %cst = arith.constant dense<0.000000e+00> : vector<16x32xf32>
    %5 = tpu.matmul %3, %4, %cst {dimension_numbers = #tpu.dot_dimension_numbers<[1], [0], [0], [1], [0, 0, 1, 1], [], []>} : vector<16x4xbf16>, vector<4x32xbf16>, vector<16x32xf32> -> vector<16x32xf32>
    %6 = vector.shape_cast %5 : vector<16x32xf32> to vector<2x8x32xf32>
    %7 = vector.extract_strided_slice %1 {offsets = [0, 0, 0], sizes = [2, 8, 1], strides = [1, 1, 1]} : vector<2x8x8xf32> to vector<2x8x1xf32>
    %8 = vector.extract_strided_slice %6 {offsets = [0, 0, 0], sizes = [2, 1, 32], strides = [1, 1, 1]} : vector<2x8x32xf32> to vector<2x1x32xf32>
    %9 = vector.broadcast %7 : vector<2x8x1xf32> to vector<2x8x32xf32>
    %10 = vector.broadcast %8 : vector<2x1x32xf32> to vector<2x8x32xf32>
    %11 = arith.mulf %9, %10 : vector<2x8x32xf32>
    %12 = vector.extract_strided_slice %1 {offsets = [0, 0, 1], sizes = [2, 8, 1], strides = [1, 1, 1]} : vector<2x8x8xf32> to vector<2x8x1xf32>
    %13 = vector.extract_strided_slice %6 {offsets = [0, 1, 0], sizes = [2, 1, 32], strides = [1, 1, 1]} : vector<2x8x32xf32> to vector<2x1x32xf32>
    %14 = vector.broadcast %12 : vector<2x8x1xf32> to vector<2x8x32xf32>
    %15 = vector.broadcast %13 : vector<2x1x32xf32> to vector<2x8x32xf32>
    %16 = arith.mulf %14, %15 : vector<2x8x32xf32>
    %17 = arith.addf %11, %16 : vector<2x8x32xf32>
    %18 = vector.extract_strided_slice %1 {offsets = [0, 0, 2], sizes = [2, 8, 1], strides = [1, 1, 1]} : vector<2x8x8xf32> to vector<2x8x1xf32>
    %19 = vector.extract_strided_slice %6 {offsets = [0, 2, 0], sizes = [2, 1, 32], strides = [1, 1, 1]} : vector<2x8x32xf32> to vector<2x1x32xf32>
    %20 = vector.broadcast %18 : vector<2x8x1xf32> to vector<2x8x32xf32>
    %21 = vector.broadcast %19 : vector<2x1x32xf32> to vector<2x8x32xf32>
    %22 = arith.mulf %20, %21 : vector<2x8x32xf32>
    %23 = arith.addf %17, %22 : vector<2x8x32xf32>
    %24 = vector.extract_strided_slice %1 {offsets = [0, 0, 3], sizes = [2, 8, 1], strides = [1, 1, 1]} : vector<2x8x8xf32> to vector<2x8x1xf32>
    %25 = vector.extract_strided_slice %6 {offsets = [0, 3, 0], sizes = [2, 1, 32], strides = [1, 1, 1]} : vector<2x8x32xf32> to vector<2x1x32xf32>
    %26 = vector.broadcast %24 : vector<2x8x1xf32> to vector<2x8x32xf32>
    %27 = vector.broadcast %25 : vector<2x1x32xf32> to vector<2x8x32xf32>
    %28 = arith.mulf %26, %27 : vector<2x8x32xf32>
    %29 = arith.addf %23, %28 : vector<2x8x32xf32>
    %30 = vector.extract_strided_slice %1 {offsets = [0, 0, 4], sizes = [2, 8, 1], strides = [1, 1, 1]} : vector<2x8x8xf32> to vector<2x8x1xf32>
    %31 = vector.extract_strided_slice %6 {offsets = [0, 4, 0], sizes = [2, 1, 32], strides = [1, 1, 1]} : vector<2x8x32xf32> to vector<2x1x32xf32>
    %32 = vector.broadcast %30 : vector<2x8x1xf32> to vector<2x8x32xf32>
    %33 = vector.broadcast %31 : vector<2x1x32xf32> to vector<2x8x32xf32>
    %34 = arith.mulf %32, %33 : vector<2x8x32xf32>
    %35 = arith.addf %29, %34 : vector<2x8x32xf32>
    %36 = vector.extract_strided_slice %1 {offsets = [0, 0, 5], sizes = [2, 8, 1], strides = [1, 1, 1]} : vector<2x8x8xf32> to vector<2x8x1xf32>
    %37 = vector.extract_strided_slice %6 {offsets = [0, 5, 0], sizes = [2, 1, 32], strides = [1, 1, 1]} : vector<2x8x32xf32> to vector<2x1x32xf32>
    %38 = vector.broadcast %36 : vector<2x8x1xf32> to vector<2x8x32xf32>
    %39 = vector.broadcast %37 : vector<2x1x32xf32> to vector<2x8x32xf32>
    %40 = arith.mulf %38, %39 : vector<2x8x32xf32>
    %41 = arith.addf %35, %40 : vector<2x8x32xf32>
    %42 = vector.extract_strided_slice %1 {offsets = [0, 0, 6], sizes = [2, 8, 1], strides = [1, 1, 1]} : vector<2x8x8xf32> to vector<2x8x1xf32>
    %43 = vector.extract_strided_slice %6 {offsets = [0, 6, 0], sizes = [2, 1, 32], strides = [1, 1, 1]} : vector<2x8x32xf32> to vector<2x1x32xf32>
    %44 = vector.broadcast %42 : vector<2x8x1xf32> to vector<2x8x32xf32>
    %45 = vector.broadcast %43 : vector<2x1x32xf32> to vector<2x8x32xf32>
    %46 = arith.mulf %44, %45 : vector<2x8x32xf32>
    %47 = arith.addf %41, %46 : vector<2x8x32xf32>
    %48 = vector.extract_strided_slice %1 {offsets = [0, 0, 7], sizes = [2, 8, 1], strides = [1, 1, 1]} : vector<2x8x8xf32> to vector<2x8x1xf32>
    %49 = vector.extract_strided_slice %6 {offsets = [0, 7, 0], sizes = [2, 1, 32], strides = [1, 1, 1]} : vector<2x8x32xf32> to vector<2x1x32xf32>
    %50 = vector.broadcast %48 : vector<2x8x1xf32> to vector<2x8x32xf32>
    %51 = vector.broadcast %49 : vector<2x1x32xf32> to vector<2x8x32xf32>
    %52 = arith.mulf %50, %51 : vector<2x8x32xf32>
    %53 = arith.addf %47, %52 : vector<2x8x32xf32>
    %cst_7 = arith.constant 0.000000e+00 : f32
    %54 = vector.broadcast %cst_7 : f32 to vector<2x8x32xf32>
    %55 = arith.maximumf %53, %54 : vector<2x8x32xf32>
    %c0_8 = arith.constant 0 : index
    %c0_9 = arith.constant 0 : index
    %56 = memref.load %arg6[%c0_8, %c0_9] : memref<1x3xf32, #tpu.memory_space<smem>>
    %c0_10 = arith.constant 0 : index
    %c1 = arith.constant 1 : index
    %57 = memref.load %arg6[%c0_10, %c1] : memref<1x3xf32, #tpu.memory_space<smem>>
    %c0_11 = arith.constant 0 : index
    %c2 = arith.constant 2 : index
    %58 = memref.load %arg6[%c0_11, %c2] : memref<1x3xf32, #tpu.memory_space<smem>>
    %59 = vector.broadcast %56 : f32 to vector<2x8x32xf32>
    %60 = arith.mulf %59, %55 : vector<2x8x32xf32>
    %61 = arith.truncf %55 : vector<2x8x32xf32> to vector<2x8x32xbf16>
    %62 = vector.shape_cast %61 : vector<2x8x32xbf16> to vector<16x32xbf16>
    %c0_12 = arith.constant 0 : index
    %c0_13 = arith.constant 0 : index
    %63 = vector.load %arg4[%c0_12, %c0_13] : memref<32x32xbf16, #tpu.memory_space<vmem>>, vector<32x32xbf16>
    %cst_14 = arith.constant dense<0.000000e+00> : vector<16x32xf32>
    %64 = tpu.matmul %62, %63, %cst_14 {dimension_numbers = #tpu.dot_dimension_numbers<[1], [0], [0], [1], [0, 0, 1, 1], [], []>} : vector<16x32xbf16>, vector<32x32xbf16>, vector<16x32xf32> -> vector<16x32xf32>
    %65 = vector.shape_cast %64 : vector<16x32xf32> to vector<2x8x32xf32>
    %66 = vector.extract_strided_slice %1 {offsets = [0, 0, 0], sizes = [2, 8, 1], strides = [1, 1, 1]} : vector<2x8x8xf32> to vector<2x8x1xf32>
    %67 = vector.extract_strided_slice %65 {offsets = [0, 0, 0], sizes = [2, 1, 32], strides = [1, 1, 1]} : vector<2x8x32xf32> to vector<2x1x32xf32>
    %68 = vector.broadcast %66 : vector<2x8x1xf32> to vector<2x8x32xf32>
    %69 = vector.broadcast %67 : vector<2x1x32xf32> to vector<2x8x32xf32>
    %70 = arith.mulf %68, %69 : vector<2x8x32xf32>
    %71 = vector.extract_strided_slice %1 {offsets = [0, 0, 1], sizes = [2, 8, 1], strides = [1, 1, 1]} : vector<2x8x8xf32> to vector<2x8x1xf32>
    %72 = vector.extract_strided_slice %65 {offsets = [0, 1, 0], sizes = [2, 1, 32], strides = [1, 1, 1]} : vector<2x8x32xf32> to vector<2x1x32xf32>
    %73 = vector.broadcast %71 : vector<2x8x1xf32> to vector<2x8x32xf32>
    %74 = vector.broadcast %72 : vector<2x1x32xf32> to vector<2x8x32xf32>
    %75 = arith.mulf %73, %74 : vector<2x8x32xf32>
    %76 = arith.addf %70, %75 : vector<2x8x32xf32>
    %77 = vector.extract_strided_slice %1 {offsets = [0, 0, 2], sizes = [2, 8, 1], strides = [1, 1, 1]} : vector<2x8x8xf32> to vector<2x8x1xf32>
    %78 = vector.extract_strided_slice %65 {offsets = [0, 2, 0], sizes = [2, 1, 32], strides = [1, 1, 1]} : vector<2x8x32xf32> to vector<2x1x32xf32>
    %79 = vector.broadcast %77 : vector<2x8x1xf32> to vector<2x8x32xf32>
    %80 = vector.broadcast %78 : vector<2x1x32xf32> to vector<2x8x32xf32>
    %81 = arith.mulf %79, %80 : vector<2x8x32xf32>
    %82 = arith.addf %76, %81 : vector<2x8x32xf32>
    %83 = vector.extract_strided_slice %1 {offsets = [0, 0, 3], sizes = [2, 8, 1], strides = [1, 1, 1]} : vector<2x8x8xf32> to vector<2x8x1xf32>
    %84 = vector.extract_strided_slice %65 {offsets = [0, 3, 0], sizes = [2, 1, 32], strides = [1, 1, 1]} : vector<2x8x32xf32> to vector<2x1x32xf32>
    %85 = vector.broadcast %83 : vector<2x8x1xf32> to vector<2x8x32xf32>
    %86 = vector.broadcast %84 : vector<2x1x32xf32> to vector<2x8x32xf32>
    %87 = arith.mulf %85, %86 : vector<2x8x32xf32>
    %88 = arith.addf %82, %87 : vector<2x8x32xf32>
    %89 = vector.extract_strided_slice %1 {offsets = [0, 0, 4], sizes = [2, 8, 1], strides = [1, 1, 1]} : vector<2x8x8xf32> to vector<2x8x1xf32>
    %90 = vector.extract_strided_slice %65 {offsets = [0, 4, 0], sizes = [2, 1, 32], strides = [1, 1, 1]} : vector<2x8x32xf32> to vector<2x1x32xf32>
    %91 = vector.broadcast %89 : vector<2x8x1xf32> to vector<2x8x32xf32>
    %92 = vector.broadcast %90 : vector<2x1x32xf32> to vector<2x8x32xf32>
    %93 = arith.mulf %91, %92 : vector<2x8x32xf32>
    %94 = arith.addf %88, %93 : vector<2x8x32xf32>
    %95 = vector.extract_strided_slice %1 {offsets = [0, 0, 5], sizes = [2, 8, 1], strides = [1, 1, 1]} : vector<2x8x8xf32> to vector<2x8x1xf32>
    %96 = vector.extract_strided_slice %65 {offsets = [0, 5, 0], sizes = [2, 1, 32], strides = [1, 1, 1]} : vector<2x8x32xf32> to vector<2x1x32xf32>
    %97 = vector.broadcast %95 : vector<2x8x1xf32> to vector<2x8x32xf32>
    %98 = vector.broadcast %96 : vector<2x1x32xf32> to vector<2x8x32xf32>
    %99 = arith.mulf %97, %98 : vector<2x8x32xf32>
    %100 = arith.addf %94, %99 : vector<2x8x32xf32>
    %101 = vector.extract_strided_slice %1 {offsets = [0, 0, 6], sizes = [2, 8, 1], strides = [1, 1, 1]} : vector<2x8x8xf32> to vector<2x8x1xf32>
    %102 = vector.extract_strided_slice %65 {offsets = [0, 6, 0], sizes = [2, 1, 32], strides = [1, 1, 1]} : vector<2x8x32xf32> to vector<2x1x32xf32>
    %103 = vector.broadcast %101 : vector<2x8x1xf32> to vector<2x8x32xf32>
    %104 = vector.broadcast %102 : vector<2x1x32xf32> to vector<2x8x32xf32>
    %105 = arith.mulf %103, %104 : vector<2x8x32xf32>
    %106 = arith.addf %100, %105 : vector<2x8x32xf32>
    %107 = vector.extract_strided_slice %1 {offsets = [0, 0, 7], sizes = [2, 8, 1], strides = [1, 1, 1]} : vector<2x8x8xf32> to vector<2x8x1xf32>
    %108 = vector.extract_strided_slice %65 {offsets = [0, 7, 0], sizes = [2, 1, 32], strides = [1, 1, 1]} : vector<2x8x32xf32> to vector<2x1x32xf32>
    %109 = vector.broadcast %107 : vector<2x8x1xf32> to vector<2x8x32xf32>
    %110 = vector.broadcast %108 : vector<2x1x32xf32> to vector<2x8x32xf32>
    %111 = arith.mulf %109, %110 : vector<2x8x32xf32>
    %112 = arith.addf %106, %111 : vector<2x8x32xf32>
    %cst_15 = arith.constant 0.000000e+00 : f32
    %113 = vector.broadcast %cst_15 : f32 to vector<2x8x32xf32>
    %114 = arith.maximumf %112, %113 : vector<2x8x32xf32>
    %115 = vector.broadcast %57 : f32 to vector<2x8x32xf32>
    %116 = arith.mulf %115, %114 : vector<2x8x32xf32>
    %117 = arith.addf %60, %116 : vector<2x8x32xf32>
    %118 = arith.truncf %114 : vector<2x8x32xf32> to vector<2x8x32xbf16>
    %119 = vector.shape_cast %118 : vector<2x8x32xbf16> to vector<16x32xbf16>
    %c0_16 = arith.constant 0 : index
    %c0_17 = arith.constant 0 : index
    %120 = vector.load %arg5[%c0_16, %c0_17] : memref<32x32xbf16, #tpu.memory_space<vmem>>, vector<32x32xbf16>
    %cst_18 = arith.constant dense<0.000000e+00> : vector<16x32xf32>
    %121 = tpu.matmul %119, %120, %cst_18 {dimension_numbers = #tpu.dot_dimension_numbers<[1], [0], [0], [1], [0, 0, 1, 1], [], []>} : vector<16x32xbf16>, vector<32x32xbf16>, vector<16x32xf32> -> vector<16x32xf32>
    %122 = vector.shape_cast %121 : vector<16x32xf32> to vector<2x8x32xf32>
    %123 = vector.extract_strided_slice %1 {offsets = [0, 0, 0], sizes = [2, 8, 1], strides = [1, 1, 1]} : vector<2x8x8xf32> to vector<2x8x1xf32>
    %124 = vector.extract_strided_slice %122 {offsets = [0, 0, 0], sizes = [2, 1, 32], strides = [1, 1, 1]} : vector<2x8x32xf32> to vector<2x1x32xf32>
    %125 = vector.broadcast %123 : vector<2x8x1xf32> to vector<2x8x32xf32>
    %126 = vector.broadcast %124 : vector<2x1x32xf32> to vector<2x8x32xf32>
    %127 = arith.mulf %125, %126 : vector<2x8x32xf32>
    %128 = vector.extract_strided_slice %1 {offsets = [0, 0, 1], sizes = [2, 8, 1], strides = [1, 1, 1]} : vector<2x8x8xf32> to vector<2x8x1xf32>
    %129 = vector.extract_strided_slice %122 {offsets = [0, 1, 0], sizes = [2, 1, 32], strides = [1, 1, 1]} : vector<2x8x32xf32> to vector<2x1x32xf32>
    %130 = vector.broadcast %128 : vector<2x8x1xf32> to vector<2x8x32xf32>
    %131 = vector.broadcast %129 : vector<2x1x32xf32> to vector<2x8x32xf32>
    %132 = arith.mulf %130, %131 : vector<2x8x32xf32>
    %133 = arith.addf %127, %132 : vector<2x8x32xf32>
    %134 = vector.extract_strided_slice %1 {offsets = [0, 0, 2], sizes = [2, 8, 1], strides = [1, 1, 1]} : vector<2x8x8xf32> to vector<2x8x1xf32>
    %135 = vector.extract_strided_slice %122 {offsets = [0, 2, 0], sizes = [2, 1, 32], strides = [1, 1, 1]} : vector<2x8x32xf32> to vector<2x1x32xf32>
    %136 = vector.broadcast %134 : vector<2x8x1xf32> to vector<2x8x32xf32>
    %137 = vector.broadcast %135 : vector<2x1x32xf32> to vector<2x8x32xf32>
    %138 = arith.mulf %136, %137 : vector<2x8x32xf32>
    %139 = arith.addf %133, %138 : vector<2x8x32xf32>
    %140 = vector.extract_strided_slice %1 {offsets = [0, 0, 3], sizes = [2, 8, 1], strides = [1, 1, 1]} : vector<2x8x8xf32> to vector<2x8x1xf32>
    %141 = vector.extract_strided_slice %122 {offsets = [0, 3, 0], sizes = [2, 1, 32], strides = [1, 1, 1]} : vector<2x8x32xf32> to vector<2x1x32xf32>
    %142 = vector.broadcast %140 : vector<2x8x1xf32> to vector<2x8x32xf32>
    %143 = vector.broadcast %141 : vector<2x1x32xf32> to vector<2x8x32xf32>
    %144 = arith.mulf %142, %143 : vector<2x8x32xf32>
    %145 = arith.addf %139, %144 : vector<2x8x32xf32>
    %146 = vector.extract_strided_slice %1 {offsets = [0, 0, 4], sizes = [2, 8, 1], strides = [1, 1, 1]} : vector<2x8x8xf32> to vector<2x8x1xf32>
    %147 = vector.extract_strided_slice %122 {offsets = [0, 4, 0], sizes = [2, 1, 32], strides = [1, 1, 1]} : vector<2x8x32xf32> to vector<2x1x32xf32>
    %148 = vector.broadcast %146 : vector<2x8x1xf32> to vector<2x8x32xf32>
    %149 = vector.broadcast %147 : vector<2x1x32xf32> to vector<2x8x32xf32>
    %150 = arith.mulf %148, %149 : vector<2x8x32xf32>
    %151 = arith.addf %145, %150 : vector<2x8x32xf32>
    %152 = vector.extract_strided_slice %1 {offsets = [0, 0, 5], sizes = [2, 8, 1], strides = [1, 1, 1]} : vector<2x8x8xf32> to vector<2x8x1xf32>
    %153 = vector.extract_strided_slice %122 {offsets = [0, 5, 0], sizes = [2, 1, 32], strides = [1, 1, 1]} : vector<2x8x32xf32> to vector<2x1x32xf32>
    %154 = vector.broadcast %152 : vector<2x8x1xf32> to vector<2x8x32xf32>
    %155 = vector.broadcast %153 : vector<2x1x32xf32> to vector<2x8x32xf32>
    %156 = arith.mulf %154, %155 : vector<2x8x32xf32>
    %157 = arith.addf %151, %156 : vector<2x8x32xf32>
    %158 = vector.extract_strided_slice %1 {offsets = [0, 0, 6], sizes = [2, 8, 1], strides = [1, 1, 1]} : vector<2x8x8xf32> to vector<2x8x1xf32>
    %159 = vector.extract_strided_slice %122 {offsets = [0, 6, 0], sizes = [2, 1, 32], strides = [1, 1, 1]} : vector<2x8x32xf32> to vector<2x1x32xf32>
    %160 = vector.broadcast %158 : vector<2x8x1xf32> to vector<2x8x32xf32>
    %161 = vector.broadcast %159 : vector<2x1x32xf32> to vector<2x8x32xf32>
    %162 = arith.mulf %160, %161 : vector<2x8x32xf32>
    %163 = arith.addf %157, %162 : vector<2x8x32xf32>
    %164 = vector.extract_strided_slice %1 {offsets = [0, 0, 7], sizes = [2, 8, 1], strides = [1, 1, 1]} : vector<2x8x8xf32> to vector<2x8x1xf32>
    %165 = vector.extract_strided_slice %122 {offsets = [0, 7, 0], sizes = [2, 1, 32], strides = [1, 1, 1]} : vector<2x8x32xf32> to vector<2x1x32xf32>
    %166 = vector.broadcast %164 : vector<2x8x1xf32> to vector<2x8x32xf32>
    %167 = vector.broadcast %165 : vector<2x1x32xf32> to vector<2x8x32xf32>
    %168 = arith.mulf %166, %167 : vector<2x8x32xf32>
    %169 = arith.addf %163, %168 : vector<2x8x32xf32>
    %170 = vector.broadcast %58 : f32 to vector<2x8x32xf32>
    %171 = arith.mulf %170, %169 : vector<2x8x32xf32>
    %172 = arith.addf %117, %171 : vector<2x8x32xf32>
    %cst_19 = arith.constant dense<0.000000e+00> : vector<2x32xf32>
    %173 = vector.multi_reduction <add>, %172, %cst_19 [1] : vector<2x8x32xf32> to vector<2x32xf32>
    %174 = arith.truncf %173 : vector<2x32xf32> to vector<2x32xbf16>
    %c0_20 = arith.constant 0 : index
    %c0_21 = arith.constant 0 : index
    %175 = vector.load %arg7[%c0_20, %c0_21] : memref<32x32xbf16, #tpu.memory_space<vmem>>, vector<32x32xbf16>
    %cst_22 = arith.constant dense<0.000000e+00> : vector<2x32xf32>
    %176 = tpu.matmul %174, %175, %cst_22 {dimension_numbers = #tpu.dot_dimension_numbers<[1], [0], [0], [1], [0, 0, 1, 1], [], []>} : vector<2x32xbf16>, vector<32x32xbf16>, vector<2x32xf32> -> vector<2x32xf32>
    %c0_23 = arith.constant 0 : index
    %c0_24 = arith.constant 0 : index
    %177 = vector.load %arg8[%c0_23, %c0_24] : memref<1x32xf32, #tpu.memory_space<vmem>>, vector<1x32xf32>
    %178 = vector.broadcast %177 : vector<1x32xf32> to vector<2x32xf32>
    %179 = arith.addf %176, %178 : vector<2x32xf32>
    %180 = math.tanh %179 : vector<2x32xf32>
    %181 = arith.truncf %180 : vector<2x32xf32> to vector<2x32xbf16>
    %c0_25 = arith.constant 0 : index
    %c0_26 = arith.constant 0 : index
    %182 = vector.load %arg9[%c0_25, %c0_26] : memref<32x4xbf16, #tpu.memory_space<vmem>>, vector<32x4xbf16>
    %cst_27 = arith.constant dense<0.000000e+00> : vector<2x4xf32>
    %183 = tpu.matmul %181, %182, %cst_27 {dimension_numbers = #tpu.dot_dimension_numbers<[1], [0], [0], [1], [0, 0, 1, 1], [], []>} : vector<2x32xbf16>, vector<32x4xbf16>, vector<2x4xf32> -> vector<2x4xf32>
    %c0_28 = arith.constant 0 : index
    %c0_29 = arith.constant 0 : index
    %184 = vector.load %arg10[%c0_28, %c0_29] : memref<1x4xf32, #tpu.memory_space<vmem>>, vector<1x4xf32>
    %185 = vector.broadcast %184 : vector<1x4xf32> to vector<2x4xf32>
    %186 = arith.addf %183, %185 : vector<2x4xf32>
    %cst_30 = arith.constant 0.000000e+00 : f32
    %187 = vector.broadcast %cst_30 : f32 to vector<2x4xf32>
    %188 = arith.subf %187, %186 : vector<2x4xf32>
    %189 = math.exp %188 : vector<2x4xf32>
    %cst_31 = arith.constant 1.000000e+00 : f32
    %190 = vector.broadcast %cst_31 : f32 to vector<2x4xf32>
    %191 = arith.addf %190, %189 : vector<2x4xf32>
    %cst_32 = arith.constant 1.000000e+00 : f32
    %192 = vector.broadcast %cst_32 : f32 to vector<2x4xf32>
    %193 = arith.divf %192, %191 : vector<2x4xf32>
    %194 = vector.extract_strided_slice %0 {offsets = [0, 0, 0], sizes = [2, 1, 4], strides = [1, 1, 1]} : vector<2x8x4xf32> to vector<2x1x4xf32>
    %195 = vector.shape_cast %194 : vector<2x1x4xf32> to vector<2x4xf32>
    %196 = arith.mulf %195, %193 : vector<2x4xf32>
    %cst_33 = arith.constant 1.000000e+00 : f32
    %197 = vector.broadcast %cst_33 : f32 to vector<2x4xf32>
    %198 = arith.subf %197, %195 : vector<2x4xf32>
    %cst_34 = arith.constant 1.000000e+00 : f32
    %199 = vector.broadcast %cst_34 : f32 to vector<2x4xf32>
    %200 = arith.subf %199, %193 : vector<2x4xf32>
    %201 = arith.mulf %198, %200 : vector<2x4xf32>
    %202 = arith.addf %196, %201 : vector<2x4xf32>
    %cst_35 = arith.constant 9.99999993E-9 : f32
    %203 = vector.broadcast %cst_35 : f32 to vector<2x4xf32>
    %204 = arith.addf %202, %203 : vector<2x4xf32>
    %205 = math.log %204 : vector<2x4xf32>
    %cst_36 = arith.constant 0.000000e+00 : f32
    %206 = vector.broadcast %cst_36 : f32 to vector<2x4xf32>
    %207 = arith.subf %206, %205 : vector<2x4xf32>
    %cst_37 = arith.constant dense<0.000000e+00> : vector<2xf32>
    %208 = vector.multi_reduction <add>, %207, %cst_37 [1] : vector<2x4xf32> to vector<2xf32>
    %c0_38 = arith.constant 0 : index
    %c0_39 = arith.constant 0 : index
    %209 = vector.load %arg11[%c0_38, %c0_39] : memref<96x32xbf16, #tpu.memory_space<vmem>>, vector<96x32xbf16>
    %210 = vector.extract_strided_slice %209 {offsets = [0, 0], sizes = [32, 32], strides = [1, 1]} : vector<96x32xbf16> to vector<32x32xbf16>
    %211 = vector.extract_strided_slice %209 {offsets = [32, 0], sizes = [32, 32], strides = [1, 1]} : vector<96x32xbf16> to vector<32x32xbf16>
    %212 = vector.extract_strided_slice %209 {offsets = [64, 0], sizes = [32, 32], strides = [1, 1]} : vector<96x32xbf16> to vector<32x32xbf16>
    %213 = vector.extract_strided_slice %172 {offsets = [0, 0, 0], sizes = [2, 1, 32], strides = [1, 1, 1]} : vector<2x8x32xf32> to vector<2x1x32xf32>
    %214 = vector.shape_cast %213 : vector<2x1x32xf32> to vector<2x32xf32>
    %cst_40 = arith.constant dense<0.000000e+00> : vector<2x32xf32>
    %215 = tpu.matmul %174, %210, %cst_40 {dimension_numbers = #tpu.dot_dimension_numbers<[1], [0], [0], [1], [0, 0, 1, 1], [], []>} : vector<2x32xbf16>, vector<32x32xbf16>, vector<2x32xf32> -> vector<2x32xf32>
    %216 = arith.truncf %214 : vector<2x32xf32> to vector<2x32xbf16>
    %cst_41 = arith.constant dense<0.000000e+00> : vector<2x32xf32>
    %217 = tpu.matmul %216, %211, %cst_41 {dimension_numbers = #tpu.dot_dimension_numbers<[1], [0], [0], [1], [0, 0, 1, 1], [], []>} : vector<2x32xbf16>, vector<32x32xbf16>, vector<2x32xf32> -> vector<2x32xf32>
    %218 = arith.addf %215, %217 : vector<2x32xf32>
    %c0_42 = arith.constant 0 : index
    %c0_43 = arith.constant 0 : index
    %219 = vector.load %arg12[%c0_42, %c0_43] : memref<1x32xf32, #tpu.memory_space<vmem>>, vector<1x32xf32>
    %220 = vector.broadcast %219 : vector<1x32xf32> to vector<2x32xf32>
    %221 = arith.addf %218, %220 : vector<2x32xf32>
    %222 = arith.truncf %172 : vector<2x8x32xf32> to vector<2x8x32xbf16>
    %223 = vector.shape_cast %222 : vector<2x8x32xbf16> to vector<16x32xbf16>
    %cst_44 = arith.constant dense<0.000000e+00> : vector<16x32xf32>
    %224 = tpu.matmul %223, %212, %cst_44 {dimension_numbers = #tpu.dot_dimension_numbers<[1], [0], [0], [1], [0, 0, 1, 1], [], []>} : vector<16x32xbf16>, vector<32x32xbf16>, vector<16x32xf32> -> vector<16x32xf32>
    %225 = vector.shape_cast %224 : vector<16x32xf32> to vector<2x8x32xf32>
    %226 = vector.shape_cast %221 : vector<2x32xf32> to vector<2x1x32xf32>
    %227 = vector.broadcast %226 : vector<2x1x32xf32> to vector<2x8x32xf32>
    %228 = arith.addf %225, %227 : vector<2x8x32xf32>
    %229 = math.tanh %228 : vector<2x8x32xf32>
    %c0_45 = arith.constant 0 : index
    %c0_46 = arith.constant 0 : index
    %230 = vector.load %arg13[%c0_45, %c0_46] : memref<1x32xf32, #tpu.memory_space<vmem>>, vector<1x32xf32>
    %231 = vector.shape_cast %230 : vector<1x32xf32> to vector<1x1x32xf32>
    %232 = vector.broadcast %231 : vector<1x1x32xf32> to vector<2x8x32xf32>
    %233 = arith.mulf %229, %232 : vector<2x8x32xf32>
    %cst_47 = arith.constant dense<0.000000e+00> : vector<2x8xf32>
    %234 = vector.multi_reduction <add>, %233, %cst_47 [2] : vector<2x8x32xf32> to vector<2x8xf32>
    %c0_48 = arith.constant 0 : index
    %c0_49 = arith.constant 0 : index
    %235 = vector.load %arg14[%c0_48, %c0_49] : memref<1x1xf32, #tpu.memory_space<vmem>>, vector<1x1xf32>
    %236 = vector.broadcast %235 : vector<1x1xf32> to vector<2x8xf32>
    %237 = arith.addf %234, %236 : vector<2x8xf32>
    %cst_50 = arith.constant 0.000000e+00 : f32
    %238 = vector.broadcast %cst_50 : f32 to vector<2x8xf32>
    %239 = arith.subf %238, %237 : vector<2x8xf32>
    %240 = math.exp %239 : vector<2x8xf32>
    %cst_51 = arith.constant 1.000000e+00 : f32
    %241 = vector.broadcast %cst_51 : f32 to vector<2x8xf32>
    %242 = arith.addf %241, %240 : vector<2x8xf32>
    %cst_52 = arith.constant 1.000000e+00 : f32
    %243 = vector.broadcast %cst_52 : f32 to vector<2x8xf32>
    %244 = arith.divf %243, %242 : vector<2x8xf32>
    %245 = vector.extract_strided_slice %1 {offsets = [0, 0, 0], sizes = [2, 1, 8], strides = [1, 1, 1]} : vector<2x8x8xf32> to vector<2x1x8xf32>
    %246 = vector.shape_cast %245 : vector<2x1x8xf32> to vector<2x8xf32>
    %247 = arith.mulf %246, %244 : vector<2x8xf32>
    %cst_53 = arith.constant 1.000000e+00 : f32
    %248 = vector.broadcast %cst_53 : f32 to vector<2x8xf32>
    %249 = arith.subf %248, %246 : vector<2x8xf32>
    %cst_54 = arith.constant 1.000000e+00 : f32
    %250 = vector.broadcast %cst_54 : f32 to vector<2x8xf32>
    %251 = arith.subf %250, %244 : vector<2x8xf32>
    %252 = arith.mulf %249, %251 : vector<2x8xf32>
    %253 = arith.addf %247, %252 : vector<2x8xf32>
    %cst_55 = arith.constant 9.99999993E-9 : f32
    %254 = vector.broadcast %cst_55 : f32 to vector<2x8xf32>
    %255 = arith.addf %253, %254 : vector<2x8xf32>
    %256 = math.log %255 : vector<2x8xf32>
    %cst_56 = arith.constant 0.000000e+00 : f32
    %257 = vector.broadcast %cst_56 : f32 to vector<2x8xf32>
    %258 = arith.subf %257, %256 : vector<2x8xf32>
    %cst_57 = arith.constant dense<0.000000e+00> : vector<2xf32>
    %259 = vector.multi_reduction <add>, %258, %cst_57 [1] : vector<2x8xf32> to vector<2xf32>
    %260 = vector.shape_cast %208 : vector<2xf32> to vector<1x2xf32>
    %c0_58 = arith.constant 0 : index
    %c0_59 = arith.constant 0 : index
    %261 = vector.load %arg15[%c0_58, %c0_59] : memref<1x2xf32, #tpu.memory_space<vmem>>, vector<1x2xf32>
    tpu.vector_store %arg15[%c0_58, %c0_59], %260 {strides = array<i32>} : memref<1x2xf32, #tpu.memory_space<vmem>>, vector<1x2xf32>,
    %262 = vector.shape_cast %259 : vector<2xf32> to vector<1x2xf32>
    %c0_60 = arith.constant 0 : index
    %c0_61 = arith.constant 0 : index
    %263 = vector.load %arg16[%c0_60, %c0_61] : memref<1x2xf32, #tpu.memory_space<vmem>>, vector<1x2xf32>
    tpu.vector_store %arg16[%c0_60, %c0_61], %262 {strides = array<i32>} : memref<1x2xf32, #tpu.memory_space<vmem>>, vector<1x2xf32>,
    return
  }
  func.func @transform_0(%arg0: i32) -> (i32, i32, i32) {
    %c0_i32 = arith.constant 0 : i32
    %c0_i32_0 = arith.constant 0 : i32
    %c0_i32_1 = arith.constant 0 : i32
    return %arg0, %c0_i32, %c0_i32_0 : i32, i32, i32
  }
  func.func @transform_1(%arg0: i32) -> (i32, i32, i32) {
    %c0_i32 = arith.constant 0 : i32
    %c0_i32_0 = arith.constant 0 : i32
    %c0_i32_1 = arith.constant 0 : i32
    return %arg0, %c0_i32, %c0_i32_0 : i32, i32, i32
  }
  func.func @transform_2(%arg0: i32) -> (i32, i32) {
    %c0_i32 = arith.constant 0 : i32
    %c0_i32_0 = arith.constant 0 : i32
    %c0_i32_1 = arith.constant 0 : i32
    return %c0_i32, %c0_i32_0 : i32, i32
  }
  func.func @transform_3(%arg0: i32) -> (i32, i32) {
    %c0_i32 = arith.constant 0 : i32
    %c0_i32_0 = arith.constant 0 : i32
    %c0_i32_1 = arith.constant 0 : i32
    return %c0_i32, %c0_i32_0 : i32, i32
  }
  func.func @transform_4(%arg0: i32) -> (i32, i32) {
    %c0_i32 = arith.constant 0 : i32
    %c0_i32_0 = arith.constant 0 : i32
    %c0_i32_1 = arith.constant 0 : i32
    return %c0_i32, %c0_i32_0 : i32, i32
  }
  func.func @transform_5(%arg0: i32) -> (i32, i32) {
    %c0_i32 = arith.constant 0 : i32
    %c0_i32_0 = arith.constant 0 : i32
    %c0_i32_1 = arith.constant 0 : i32
    return %c0_i32, %c0_i32_0 : i32, i32
  }
  func.func @transform_6(%arg0: i32) -> (i32, i32) {
    %c0_i32 = arith.constant 0 : i32
    %c0_i32_0 = arith.constant 0 : i32
    %c0_i32_1 = arith.constant 0 : i32
    return %c0_i32, %c0_i32_0 : i32, i32
  }
  func.func @transform_7(%arg0: i32) -> (i32, i32) {
    %c0_i32 = arith.constant 0 : i32
    %c0_i32_0 = arith.constant 0 : i32
    %c0_i32_1 = arith.constant 0 : i32
    return %c0_i32, %c0_i32_0 : i32, i32
  }
  func.func @transform_8(%arg0: i32) -> (i32, i32) {
    %c0_i32 = arith.constant 0 : i32
    %c0_i32_0 = arith.constant 0 : i32
    %c0_i32_1 = arith.constant 0 : i32
    return %c0_i32, %c0_i32_0 : i32, i32
  }
  func.func @transform_9(%arg0: i32) -> (i32, i32) {
    %c0_i32 = arith.constant 0 : i32
    %c0_i32_0 = arith.constant 0 : i32
    %c0_i32_1 = arith.constant 0 : i32
    return %c0_i32, %c0_i32_0 : i32, i32
  }
  func.func @transform_10(%arg0: i32) -> (i32, i32) {
    %c0_i32 = arith.constant 0 : i32
    %c0_i32_0 = arith.constant 0 : i32
    %c0_i32_1 = arith.constant 0 : i32
    return %c0_i32, %c0_i32_0 : i32, i32
  }
  func.func @transform_11(%arg0: i32) -> (i32, i32) {
    %c0_i32 = arith.constant 0 : i32
    %c0_i32_0 = arith.constant 0 : i32
    %c0_i32_1 = arith.constant 0 : i32
    return %c0_i32, %c0_i32_0 : i32, i32
  }
  func.func @transform_12(%arg0: i32) -> (i32, i32) {
    %c0_i32 = arith.constant 0 : i32
    %c0_i32_0 = arith.constant 0 : i32
    %c0_i32_1 = arith.constant 0 : i32
    return %c0_i32, %c0_i32_0 : i32, i32
  }
  func.func @transform_13(%arg0: i32) -> (i32, i32) {
    %c0_i32 = arith.constant 0 : i32
    %c0_i32_0 = arith.constant 0 : i32
    %c0_i32_1 = arith.constant 0 : i32
    return %c0_i32, %c0_i32_0 : i32, i32
  }
  func.func @transform_14(%arg0: i32) -> (i32, i32) {
    %c0_i32 = arith.constant 0 : i32
    %c0_i32_0 = arith.constant 0 : i32
    return %c0_i32, %arg0 : i32, i32
  }
  func.func @transform_15(%arg0: i32) -> (i32, i32) {
    %c0_i32 = arith.constant 0 : i32
    %c0_i32_0 = arith.constant 0 : i32
    return %c0_i32, %arg0 : i32, i32
  }
}

</mosaic_0001>

<bundles_post_ra>
// kernel: tpu_custom_call.1
= control target key start
LH: loop header
LB: loop body
LE: loop exit
PB: predicated region body
PF: predicated region fallthrough
CT: control target
= control target key end

     0   :  { %s1914_s0 = inlined_call_operand.vmem [shape: f32[2,8,4], index: 0, kind: input, shape index: {}]   ;;  %s1915_s1 = inlined_call_operand.vmem [shape: f32[2,8,8], index: 1, kind: input, shape index: {}]   ;;  %s1916_s2 = inlined_call_operand.vmem [shape: bf16[4,32], index: 2, kind: input, shape index: {}]   ;;  %s1917_s3 = inlined_call_operand.vmem [shape: bf16[32,32], index: 3, kind: input, shape index: {}]   ;;  %s1918_s4 = inlined_call_operand.vmem [shape: bf16[32,32], index: 4, kind: input, shape index: {}]   ;;  %s1919_s5 = inlined_call_operand.vmem [shape: f32[1,3], index: 5, kind: input, shape index: {}]   ;;  %s1920_s6 = inlined_call_operand.vmem [shape: bf16[32,32], index: 6, kind: input, shape index: {}]   ;;  %s1921_s7 = inlined_call_operand.vmem [shape: f32[1,32], index: 7, kind: input, shape index: {}]   ;;  %s1922_s8 = inlined_call_operand.vmem [shape: bf16[32,4], index: 8, kind: input, shape index: {}]   ;;  %s1923_s9 = inlined_call_operand.vmem [shape: f32[1,4], index: 9, kind: input, shape index: {}]   ;;  %s1924_s10 = inlined_call_operand.vmem [shape: bf16[96,32], index: 10, kind: input, shape index: {}]   ;;  %s1925_s11 = inlined_call_operand.vmem [shape: f32[1,32], index: 11, kind: input, shape index: {}]   ;;  %s1926_s12 = inlined_call_operand.vmem [shape: f32[1,32], index: 12, kind: input, shape index: {}]   ;;  %s1927_s13 = inlined_call_operand.<no memory space> [shape: f32[1,1], index: 13, kind: input, shape index: {}]   ;;  %s1928_s14 = inlined_call_operand.hbm [shape: f32[1,2], index: 14, kind: output, shape index: {0}]   ;;  %s1929_s15 = inlined_call_operand.hbm [shape: f32[1,2], index: 15, kind: output, shape index: {1}]  }
   0x1   :  { %v21_v0 = vstv %s1927_s13 }
   0x2   :  { %22 = vst [vmem:[#allocation2] sm:$0x1] %v21_v0 }
   0x3   :  { %23 = vsyncpa [#allocation5], 0 }
   0x4   :  { %24 = vsyncpa [#allocation4], 0 }
   0x5   :  { %25 = vsyncpa [#allocation8], 0  ;;  %s42_s22 = sshll.u32 %s1919_s5, 4  ;;  %s43_s22 = int_to_ptr.vmem [resolvable:$true] %s42_s22 }
   0x6   :  { %s1383_s23 = scalar_lea.vmem %s43_s22, 16  ;;  %p1388_p1 = scmp.lt.s32.totalorder %s43_s22, %s43_s22 }
   0x7   :  { %p1384_p0 = scmp.ne.s32.totalorder %s43_s22, %s1383_s23  ;;  %p1389_p2 = scmp.lt.s32.totalorder %s1383_s23, %s1383_s23 }
   0x9   :  { %p1390_p3 = por %p1389_p2, %p1388_p1 }
   0xb   :  { %p1391_p4 = pnand %p1390_p3, %p1384_p0 }
   0xd   :  { %1394 = shalt.err (!%p1391_p4)
}
   0xe   :  { %s1445_s24 = smov [#allocation3]  }
   0xf   :  { %45 = dma.vmem_to_smem %s43_s22, 16, %s1445_s24, [#allocation5]  }
  0x10   :  { %1439 = dma.done.wait [#allocation5], 16  }
  0x11   :  { %1440 = vsyncadd [#allocation5], 4294967280 }
  0x12   :  { %65 = sfence }
  0x13   :  { %v73_v1 = vld [vmem:[%s1916_s2] sm:$0x3]  ;;  %vm83_vm0 = vcmask 1041408   ;;  %v1446_v3 = vmov 0.0   ;;  %vm1447_vm1 = vmmov 0   ;;  %v1559_v5 = vld [vmem:[%s1914_s0 + $0x8] sm:$0xff]  ;;  %v138_v26 = vlaneseq }
  0x14   :  { %v1551_v2 = vld [vmem:[%s1914_s0] sm:$0xff]  ;;  %1254 = vmatprep.subr.bf16.mxu0 %v1446_v3  ;;  %v85_v4 = vsel %vm83_vm0, %v73_v1, 0  ;;  %1256 = vmatprep.mubr.msk.bf16.mxu0 %vm1447_vm1, %v1446_v3  ;;  %vm79_vm2 = vcmask 31744   ;;  %v1448_v8 = vmov 1   ;;  %v1573_v9 = vld [vmem:[%s1915_s1 + $0x8] sm:$0xff]  ;;  %v1449_v10 = vmov 0  }
  0x15   :  { %v1564_v6 = vld [vmem:[%s1915_s1] sm:$0xff]  ;;  %1255 = vmatpush3.bf16.msra.mxu0 %v85_v4  ;;  %v1227_v7 = vpack.c.bf16 %v1559_v5, %v1551_v2  ;;  %1331 = vset.pattern.permute.xlu1 %v1448_v8  ;;  %v1450_v11 = vmov 2   ;;  %v1451_v12 = vmov 3   ;;  %v1452_v13 = vmov 4   ;;  %v1344_v18 = vld [vmem:[%s1917_s3 + $0x8] sm:$0xff]   ;;  %s1196_s22 = sld [smem:[#allocation3 + $0x1]] }
  0x16   :  { %149 = vperm.xlu1 %1331, %v1564_v6   ;;  %1260 = vmatprep.subr.bf16.mxu1 %v1446_v3  ;;  %v1453_v14 = vmov 5   ;;  %v1454_v15 = vmov 6   ;;  %v1455_v16 = vmov 7   ;;  %v1343_v17 = vld [vmem:[%s1917_s3] sm:$0xff]   ;;  %v1620_v28 = vshrl.u32 %v138_v26, 7 }
  0x17   :  { %1330 = vset.pattern.permute.xlu0 %v1449_v10  ;;  %1264 = vmatprep.mubr.msk.bf16.mxu1 %vm1447_vm1, %v1446_v3  ;;  %vm319_vm3 = vcmask 261120   ;;  %vm662_vm4 = vcmask 1041409   ;;  %vm824_vm5 = vcmask 25600   ;;  %vm1156_vm6 = vcmask 8192  }
  0x18   :  { %1257 = vmatmul.mubr.msk.bf16.vlgmr.msra.gmra.mrb[0].mxu0 %vm79_vm2, %v1227_v7  ;;  %130 = vperm.xlu0 %1330, %v1564_v6   ;;  %v1627_v31 = vsub.s32 0, %v1620_v28  ;;  %v1630_v32 = vsub.s32 1, %v1620_v28  ;;  %v1633_v33 = vsub.s32 2, %v1620_v28  ;;  %v1640_v38 = vsub.s32 3, %v1620_v28 }
  0x19   :  { %1268 = vmatprep.subr.bf16.mxu0 %v1446_v3  ;;  %1272 = vmatprep.mubr.msk.bf16.mxu0 %vm1447_vm1, %v1446_v3  ;;  %v1648_v45 = vsub.s32 4, %v1620_v28  ;;  %v1655_v51 = vsub.s32 5, %v1620_v28  ;;  %v1665_v58 = vsub.s32 6, %v1620_v28  ;;  %v1672_v0 = vsub.s32 7, %v1620_v28 }
  0x1a   :  { %153 = vperm.xlu1 %1331, %v1573_v9   ;;  %1261 = vmatpush3.bf16.msra.mxu1 %v1343_v17  ;;  %vm1146_vm7 = vcmask 58368  }
  0x1b   :  { %1262 = vmatprep.subr.bf16.mxu1 %v1446_v3 }
  0x1c   :  { %135 = vperm.xlu0 %1330, %v1573_v9  }
  0x1e   :  { %1333 = vset.pattern.permute.xlu1 %v1450_v11  ;;  %1263 = vmatpush3.bf16.msra.mxu1 %v1344_v18 }
  0x1f   :  { %173 = vperm.xlu1 %1333, %v1573_v9   ;;  %1276 = vmatprep.subr.bf16.mxu1 %v1446_v3 }
  0x20   :  { %1332 = vset.pattern.permute.xlu0 %v1450_v11 }
  0x21   :  { %169 = vperm.xlu0 %1332, %v1564_v6  }
  0x23   :  { %1334 = vset.pattern.permute.xlu1 %v1451_v12 }
  0x24   :  { %189 = vperm.xlu1 %1334, %v1564_v6  }
  0x25   :  { %1335 = vset.pattern.permute.xlu0 %v1451_v12 }
  0x26   :  { %193 = vperm.xlu0 %1335, %v1573_v9  }
  0x28   :  { %1336 = vset.pattern.permute.xlu1 %v1452_v13 }
  0x29   :  { %209 = vperm.xlu1 %1336, %v1564_v6  }
  0x2a   :  { %1337 = vset.pattern.permute.xlu0 %v1453_v14 }
  0x2b   :  { %229 = vperm.xlu0 %1337, %v1564_v6  }
  0x2d   :  { %213 = vperm.xlu1 %1336, %v1573_v9  }
  0x2f   :  { %1340 = vset.pattern.permute.xlu0 %v1454_v15 }
  0x30   :  { %253 = vperm.xlu0 %1340, %v1573_v9  }
  0x31   :  { %1338 = vset.pattern.permute.xlu1 %v1453_v14 }
  0x32   :  { %233 = vperm.xlu1 %1338, %v1573_v9  }
  0x34   :  { %1342 = vset.pattern.permute.xlu0 %v1449_v10 }
  0x36   :  { %1339 = vset.pattern.permute.xlu1 %v1454_v15 }
  0x37   :  { %249 = vperm.xlu1 %1339, %v1564_v6  }
  0x3b   :  { %1341 = vset.pattern.permute.xlu1 %v1455_v16 }
  0x3c   :  { %269 = vperm.xlu1 %1341, %v1564_v6  }
  0x40   :  { %273 = vperm.xlu1 %1341, %v1573_v9  }
  0x95   :  { %v1603_v19 = vpop.permute.xlu1 %149 }
  0x97   :  { %v1611_v23 = vpop.permute.xlu0 %130 }
  0x99   :  { %v1605_v20 = vpop.permute.xlu1 %153 }
  0x9b   :  { %v1615_v25 = vpop.permute.xlu0 %135 }
  0x9e   :  { %v1607_v21 = vpop.permute.xlu1 %173 }
  0xa0   :  { %v1622_v29 = vpop.permute.xlu0 %169 }
  0xa3   :  { %v1609_v22 = vpop.permute.xlu1 %189 }
  0xa5   :  { %v1635_v35 = vpop.permute.xlu0 %193 }
  0xa8   :  { %v1613_v24 = vpop.permute.xlu1 %209 }
  0xaa   :  { %v1660_v55 = vpop.permute.xlu0 %229 }
  0xac   :  { %v1617_v27 = vpop.permute.xlu1 %213 }
  0xaf   :  { %v1682_v18 = vpop.permute.xlu0 %253 }
  0xb1   :  { %v1624_v30 = vpop.permute.xlu1 %233 }
  0xb6   :  { %v1642_v41 = vpop.permute.xlu1 %249 }
  0xbb   :  { %v1669_v63 = vpop.permute.xlu1 %269 }
  0xeb   :  { %v121_v34 = vpop.f32.mrb[0].mxu0 }
  0xec   :  { %v141_v36 = vrot.slane %v121_v34, %v1627_v31  ;;  %v159_v37 = vrot.slane %v121_v34, %v1630_v32  ;;  %v1258_v39 = vpop.f32.mrb[1].mxu0  ;;  %v179_v44 = vrot.slane %v121_v34, %v1633_v33  ;;  %v199_v50 = vrot.slane %v121_v34, %v1640_v38 }
  0xed   :  { %v124_v40 = vpop.f32.mrb[2].mxu0  ;;  %v219_v57 = vrot.slane %v121_v34, %v1648_v45  ;;  %v239_v7 = vrot.slane %v121_v34, %v1655_v51  ;;  %v259_v14 = vrot.slane %v121_v34, %v1665_v58  ;;  %v279_v39 = vrot.slane %v121_v34, %v1672_v0 }
  0xee   :  { %v146_v42 = vmul.f32 %v141_v36, %v1611_v23  ;;  %v164_v43 = vmul.f32 %v159_v37, %v1603_v19  ;;  %v1259_v46 = vpop.f32.mrb[3].mxu0  ;;  %v145_v47 = vrot.slane %v124_v40, %v1627_v31  ;;  %v163_v48 = vrot.slane %v124_v40, %v1630_v32 }
  0xef   :  { %v183_v49 = vrot.slane %v124_v40, %v1633_v33  ;;  %v203_v54 = vrot.slane %v124_v40, %v1640_v38  ;;  %v184_v56 = vmul.f32 %v179_v44, %v1622_v29  ;;  %v223_v62 = vrot.slane %v124_v40, %v1648_v45  ;;  %v1688_v46 = vpop.permute.xlu1 %273 }
  0xf0   :  { %v147_v52 = vmul.f32 %v145_v47, %v1615_v25  ;;  %v165_v53 = vmul.f32 %v163_v48, %v1605_v20  ;;  %v166_v59 = vadd.f32 %v164_v43, %v146_v42  ;;  %v204_v4 = vmul.f32 %v199_v50, %v1609_v22 }
  0xf1   :  { %v185_v61 = vmul.f32 %v183_v49, %v1607_v21  ;;  %v205_v10 = vmul.f32 %v203_v54, %v1635_v35  ;;  %v243_v11 = vrot.slane %v124_v40, %v1655_v51  ;;  %v224_v13 = vmul.f32 %v219_v57, %v1613_v24 }
  0xf2   :  { %v167_v60 = vadd.f32 %v165_v53, %v147_v52  ;;  %v186_v1 = vadd.f32 %v184_v56, %v166_v59  ;;  %v225_v16 = vmul.f32 %v223_v62, %v1617_v27  ;;  %v263_v17 = vrot.slane %v124_v40, %v1665_v58  ;;  %v1346_v62 = vld [vmem:[%s1918_s4 + $0x8] sm:$0xff]  }
  0xf3   :  { %v244_v37 = vmul.f32 %v239_v7, %v1660_v55  ;;  %v283_v42 = vrot.slane %v124_v40, %v1672_v0  ;;  %v245_v44 = vmul.f32 %v243_v11, %v1624_v30  ;;  %v264_v48 = vmul.f32 %v259_v14, %v1642_v41 }
  0xf4   :  { %v187_v8 = vadd.f32 %v185_v61, %v167_v60  ;;  %v206_v12 = vadd.f32 %v204_v4, %v186_v1  ;;  %v265_v50 = vmul.f32 %v263_v17, %v1682_v18  ;;  %v284_v53 = vmul.f32 %v279_v39, %v1669_v63  ;;  %v1345_v61 = vld [vmem:[%s1918_s4] sm:$0xff]   ;;  %s1735_s4 = sld [smem:[#allocation3]] }
  0xf5   :  { %v285_v54 = vmul.f32 %v283_v42, %v1688_v46  ;;  %1269 = vmatpush3.bf16.msra.mxu0 %v1345_v61 }
  0xf6   :  { %v207_v15 = vadd.f32 %v205_v10, %v187_v8  ;;  %v226_v36 = vadd.f32 %v224_v13, %v206_v12  ;;  %1270 = vmatprep.subr.bf16.mxu0 %v1446_v3 }
  0xf8   :  { %v227_v43 = vadd.f32 %v225_v16, %v207_v15  ;;  %v246_v47 = vadd.f32 %v244_v37, %v226_v36 }
  0xf9   :  { %1271 = vmatpush3.bf16.msra.mxu0 %v1346_v62 }
  0xfa   :  { %v247_v49 = vadd.f32 %v245_v44, %v227_v43  ;;  %v266_v52 = vadd.f32 %v264_v48, %v246_v47  ;;  %1284 = vmatprep.subr.bf16.mxu0 %v1446_v3 }
  0xfc   :  { %v267_v56 = vadd.f32 %v265_v50, %v247_v49  ;;  %v1694_v34 = vadd.f32 %v284_v53, %v266_v52 }
  0xfe   :  { %v1696_v40 = vadd.f32 %v285_v54, %v267_v56  ;;  %v288_v59 = vmax.f32 %v1694_v34, 0.0  ;;  %v1347_v34 = vld [vmem:[%s1920_s6] sm:$0xff]  }
 0x100   :  { %v289_v57 = vmax.f32 %v1696_v40, 0.0 }
 0x102   :  { %v1228_v60 = vpack.c.bf16 %v289_v57, %v288_v59 }
 0x104   :  { %1265 = vmatmul.mubr.msk.bf16.vlgmr.msra.gmra.mrb[0].mxu1 %vm319_vm3, %v1228_v60 }
 0x105   :  { %1280 = vmatprep.mubr.msk.bf16.mxu1 %vm1447_vm1, %v1446_v3  ;;  %1277 = vmatpush3.bf16.msra.mxu1 %v1347_v34 }
 0x106   :  { %1278 = vmatprep.subr.bf16.mxu1 %v1446_v3 }
 0x1d7   :  { %v357_v1 = vpop.f32.mrb[0].mxu1 }
 0x1d8   :  { %v367_v4 = vrot.slane %v357_v1, %v1627_v31  ;;  %v377_v7 = vrot.slane %v357_v1, %v1630_v32  ;;  %v389_v8 = vrot.slane %v357_v1, %v1633_v33  ;;  %v1266_v10 = vpop.f32.mrb[1].mxu1  ;;  %v401_v14 = vrot.slane %v357_v1, %v1640_v38 }
 0x1d9   :  { %v360_v11 = vpop.f32.mrb[2].mxu1  ;;  %v413_v42 = vrot.slane %v357_v1, %v1648_v45  ;;  %v425_v50 = vrot.slane %v357_v1, %v1655_v51  ;;  %v437_v60 = vrot.slane %v357_v1, %v1665_v58 }
 0x1da   :  { %v372_v12 = vmul.f32 %v367_v4, %v1611_v23  ;;  %v382_v13 = vmul.f32 %v377_v7, %v1603_v19  ;;  %v1267_v15 = vpop.f32.mrb[3].mxu1  ;;  %v371_v16 = vrot.slane %v360_v11, %v1627_v31  ;;  %v381_v17 = vrot.slane %v360_v11, %v1630_v32 }
 0x1db   :  { %v393_v36 = vrot.slane %v360_v11, %v1633_v33  ;;  %v394_v39 = vmul.f32 %v389_v8, %v1622_v29  ;;  %v405_v47 = vrot.slane %v360_v11, %v1640_v38  ;;  %v406_v49 = vmul.f32 %v401_v14, %v1609_v22 }
 0x1dc   :  { %v384_v37 = vadd.f32 %v382_v13, %v372_v12  ;;  %v373_v43 = vmul.f32 %v371_v16, %v1615_v25  ;;  %v383_v44 = vmul.f32 %v381_v17, %v1605_v20  ;;  %v417_v54 = vrot.slane %v360_v11, %v1648_v45 }
 0x1dd   :  { %v395_v53 = vmul.f32 %v393_v36, %v1607_v21  ;;  %v418_v56 = vmul.f32 %v413_v42, %v1613_v24  ;;  %v407_v4 = vmul.f32 %v405_v47, %v1635_v35  ;;  %v429_v7 = vrot.slane %v360_v11, %v1655_v51 }
 0x1de   :  { %v396_v48 = vadd.f32 %v394_v39, %v384_v37  ;;  %v385_v52 = vadd.f32 %v383_v44, %v373_v43  ;;  %v430_v10 = vmul.f32 %v425_v50, %v1660_v55  ;;  %v449_v12 = vrot.slane %v357_v1, %v1672_v0 }
 0x1df   :  { %v419_v13 = vmul.f32 %v417_v54, %v1617_v27  ;;  %v441_v14 = vrot.slane %v360_v11, %v1665_v58  ;;  %v442_v17 = vmul.f32 %v437_v60, %v1642_v41  ;;  %v431_v37 = vmul.f32 %v429_v7, %v1624_v30 }
 0x1e0   :  { %v408_v61 = vadd.f32 %v406_v49, %v396_v48  ;;  %v397_v62 = vadd.f32 %v395_v53, %v385_v52  ;;  %v453_v39 = vrot.slane %v360_v11, %v1672_v0  ;;  %v454_v43 = vmul.f32 %v449_v12, %v1669_v63 }
 0x1e1   :  { %v443_v47 = vmul.f32 %v441_v14, %v1682_v18  ;;  %v293_v48 = vstv %s1735_s4  ;;  %v460_v52 = vstv %s1196_s22 }
 0x1e2   :  { %v420_v8 = vadd.f32 %v418_v56, %v408_v61  ;;  %v409_v15 = vadd.f32 %v407_v4, %v397_v62  ;;  %v455_v50 = vmul.f32 %v453_v39, %v1688_v46  ;;  %v294_v56 = vmul.f32 %v293_v48, %v288_v59  ;;  %v1348_v59 = vld [vmem:[%s1920_s6 + $0x8] sm:$0xff]   ;;  %s1785_s6 = sld [smem:[#allocation3 + $0x2]] }
 0x1e3   :  { %v295_v62 = vmul.f32 %v293_v48, %v289_v57  ;;  %1279 = vmatpush3.bf16.msra.mxu1 %v1348_v59 }
 0x1e4   :  { %v432_v16 = vadd.f32 %v430_v10, %v420_v8  ;;  %v421_v36 = vadd.f32 %v419_v13, %v409_v15  ;;  %1292 = vmatprep.subr.bf16.mxu1 %v1446_v3 }
 0x1e6   :  { %v444_v42 = vadd.f32 %v442_v17, %v432_v16  ;;  %v433_v44 = vadd.f32 %v431_v37, %v421_v36 }
 0x1e8   :  { %v456_v1 = vadd.f32 %v454_v43, %v444_v42  ;;  %v445_v49 = vadd.f32 %v443_v47, %v433_v44 }
 0x1ea   :  { %v458_v53 = vmax.f32 %v456_v1, 0.0  ;;  %v457_v54 = vadd.f32 %v455_v50, %v445_v49 }
 0x1ec   :  { %v461_v60 = vmul.f32 %v460_v52, %v458_v53  ;;  %v459_v61 = vmax.f32 %v457_v54, 0.0 }
 0x1ee   :  { %v1752_v11 = vadd.f32 %v461_v60, %v294_v56  ;;  %v462_v4 = vmul.f32 %v460_v52, %v459_v61  ;;  %v1229_v7 = vpack.c.bf16 %v459_v61, %v458_v53 }
 0x1f0   :  { %v1756_v8 = vadd.f32 %v462_v4, %v295_v62  ;;  %1273 = vmatmul.mubr.msk.bf16.vlgmr.msra.gmra.mrb[4].mxu0 %vm319_vm3, %v1229_v7 }
 0x1f1   :  { %1288 = vmatprep.mubr.msk.bf16.mxu0 %vm1447_vm1, %v1446_v3 }
 0x2c3   :  { %v525_v40 = vpop.f32.mrb[4].mxu0 }
 0x2c4   :  { %v535_v57 = vrot.slane %v525_v40, %v1627_v31  ;;  %v545_v10 = vrot.slane %v525_v40, %v1630_v32  ;;  %v557_v12 = vrot.slane %v525_v40, %v1633_v33  ;;  %v1274_v13 = vpop.f32.mrb[5].mxu0  ;;  %v569_v14 = vrot.slane %v525_v40, %v1640_v38 }
 0x2c5   :  { %v528_v15 = vpop.f32.mrb[6].mxu0  ;;  %v581_v39 = vrot.slane %v525_v40, %v1648_v45  ;;  %v593_v48 = vrot.slane %v525_v40, %v1655_v51  ;;  %v605_v52 = vrot.slane %v525_v40, %v1665_v58 }
 0x2c6   :  { %v540_v16 = vmul.f32 %v535_v57, %v1611_v23  ;;  %v550_v17 = vmul.f32 %v545_v10, %v1603_v19  ;;  %v1275_v36 = vpop.f32.mrb[7].mxu0  ;;  %v562_v37 = vmul.f32 %v557_v12, %v1622_v29  ;;  %v539_v43 = vrot.slane %v528_v15, %v1627_v31 }
 0x2c7   :  { %v549_v44 = vrot.slane %v528_v15, %v1630_v32  ;;  %v561_v47 = vrot.slane %v528_v15, %v1633_v33  ;;  %v574_v1 = vmul.f32 %v569_v14, %v1609_v22  ;;  %v573_v29 = vrot.slane %v528_v15, %v1640_v38 }
 0x2c8   :  { %v552_v42 = vadd.f32 %v550_v17, %v540_v16  ;;  %v541_v23 = vmul.f32 %v539_v43, %v1615_v25  ;;  %v586_v50 = vmul.f32 %v581_v39, %v1613_v24  ;;  %v585_v22 = vrot.slane %v528_v15, %v1648_v45 }
 0x2c9   :  { %v551_v19 = vmul.f32 %v549_v44, %v1605_v20  ;;  %v563_v33 = vmul.f32 %v561_v47, %v1607_v21  ;;  %v598_v54 = vmul.f32 %v593_v48, %v1660_v55  ;;  %v617_v25 = vrot.slane %v525_v40, %v1672_v0 }
 0x2ca   :  { %v564_v49 = vadd.f32 %v562_v37, %v552_v42  ;;  %v575_v38 = vmul.f32 %v573_v29, %v1635_v35  ;;  %v597_v60 = vrot.slane %v528_v15, %v1655_v51  ;;  %v610_v24 = vmul.f32 %v605_v52, %v1642_v41 }
 0x2cb   :  { %v553_v53 = vadd.f32 %v551_v19, %v541_v23  ;;  %v587_v4 = vmul.f32 %v585_v22, %v1617_v27  ;;  %v609_v21 = vrot.slane %v528_v15, %v1665_v58  ;;  %v622_v45 = vmul.f32 %v617_v25, %v1669_v63  ;;  %v1350_v22 = vld [vmem:[%s1924_s10 + $0x18] sm:$0xff]  }
 0x2cc   :  { %v576_v32 = vadd.f32 %v574_v1, %v564_v49  ;;  %v599_v34 = vmul.f32 %v597_v60, %v1624_v30  ;;  %v621_v59 = vrot.slane %v528_v15, %v1672_v0  ;;  %v626_v40 = vstv %s1785_s6  ;;  %v1206_v60 = vld [vmem:[%s1921_s7] ss:$0 sm:$0xff] }
 0x2cd   :  { %v565_v56 = vadd.f32 %v563_v33, %v553_v53  ;;  %v611_v51 = vmul.f32 %v609_v21, %v1682_v18  ;;  %v1349_v53 = vld [vmem:[%s1924_s10 + $0x10] sm:$0xff]  }
 0x2ce   :  { %v588_v20 = vadd.f32 %v586_v50, %v576_v32  ;;  %v623_v12 = vmul.f32 %v621_v59, %v1688_v46 }
 0x2cf   :  { %v577_v62 = vadd.f32 %v575_v38, %v565_v56  ;;  %v1353_v56 = vld [vmem:[%s1922_s8] sm:$0xff]   ;;  %v1354_v38 = vld [vmem:[%s1922_s8 + $0x8] sm:$0xff]  }
 0x2d0   :  { %v600_v61 = vadd.f32 %v598_v54, %v588_v20  ;;  %v1351_v54 = vld [vmem:[%s1924_s10 + $0x20] sm:$0xff]   ;;  %v1352_v20 = vld [vmem:[%s1924_s10 + $0x28] sm:$0xff]   ;;  %1285 = vmatpush3.bf16.msra.mxu0 %v1353_v56 }
 0x2d1   :  { %v589_v7 = vadd.f32 %v587_v4, %v577_v62  ;;  %1286 = vmatprep.subr.bf16.mxu0 %v1446_v3 }
 0x2d2   :  { %v612_v55 = vadd.f32 %v610_v24, %v600_v61 }
 0x2d3   :  { %v601_v57 = vadd.f32 %v599_v34, %v589_v7 }
 0x2d4   :  { %v624_v35 = vadd.f32 %v622_v45, %v612_v55  ;;  %1287 = vmatpush3.bf16.msra.mxu0 %v1354_v38 }
 0x2d5   :  { %v613_v10 = vadd.f32 %v611_v51, %v601_v57  ;;  %1300 = vmatprep.subr.bf16.mxu0 %v1446_v3 }
 0x2d6   :  { %v627_v41 = vmul.f32 %v626_v40, %v624_v35 }
 0x2d7   :  { %v625_v27 = vadd.f32 %v623_v12, %v613_v10 }
 0x2d8   :  { %v629_v58 = vadd.f32 %v627_v41, %v1752_v11  ;;  %v1356_v41 = vld [vmem:[%s1924_s10 + $0x8] sm:$0xff]  }
 0x2d9   :  { %v628_v13 = vmul.f32 %v626_v40, %v625_v27  ;;  %v1355_v40 = vld [vmem:[%s1924_s10] sm:$0xff]  }
 0x2da   :  { %v631_v63 = vsel %vm319_vm3, %v629_v58, 0.0  ;;  %v840_v15 = vpack.c.bf16 %v629_v58, %v629_v58  ;;  %v1210_v27 = vld [vmem:[%s1923_s9] ss:$0 sm:$0xff] }
 0x2db   :  { %v632_v14 = vrot.slane %v631_v63, 4  ;;  %v630_v30 = vadd.f32 %v628_v13, %v1756_v8 }
 0x2dc   :  { %v844_v43 = vunpack.c.l.b16 %v840_v15 }
 0x2dd   :  { %v633_v16 = vadd.f32 %v632_v14, %v631_v63  ;;  %v638_v0 = vsel %vm319_vm3, %v630_v30, 0.0  ;;  %v841_v17 = vpack.c.bf16 %v630_v30, %v630_v30  ;;  %v1230_v36 = vpack.c.bf16 %v630_v30, %v629_v58 }
 0x2de   :  { %v639_v37 = vrot.slane %v638_v0, 4  ;;  %v1456_v14 = vmov 1966171168  }
 0x2df   :  { %v634_v18 = vrot.slane %v633_v16, 2  ;;  %v845_v39 = vunpack.c.l.b16 %v841_v17  ;;  %v1023_v30 = vunpack.c.l.s4 %v1456_v14 }
 0x2e0   :  { %v640_v46 = vadd.f32 %v639_v37, %v638_v0 }
 0x2e1   :  { %v635_v42 = vadd.f32 %v634_v18, %v633_v16  ;;  %v846_v11 = vrot.slane %v845_v39, 7  ;;  %v1220_v18 = vld [vmem:[%s1925_s11] ss:$0 sm:$0xff] }
 0x2e2   :  { %v641_v47 = vrot.slane %v640_v46, 2 }
 0x2e3   :  { %v636_v44 = vrot.slane %v635_v42, 1  ;;  %v847_v1 = vsel %vm662_vm4, %v846_v11, %v844_v43 }
 0x2e4   :  { %v642_v8 = vadd.f32 %v641_v47, %v640_v46  ;;  %v848_v25 = vpack.c.b16 %v847_v1, %v847_v1 }
 0x2e5   :  { %v637_v48 = vadd.f32 %v636_v44, %v635_v42 }
 0x2e6   :  { %v643_v49 = vrot.slane %v642_v8, 1 }
 0x2e7   :  { %v645_v19 = vpack.c.bf16 %v637_v48, %v637_v48 }
 0x2e8   :  { %v644_v23 = vadd.f32 %v643_v49, %v642_v8 }
 0x2e9   :  { %v660_v50 = vunpack.c.l.b16 %v645_v19 }
 0x2ea   :  { %v646_v29 = vpack.c.bf16 %v644_v23, %v644_v23 }
 0x2ec   :  { %v661_v52 = vunpack.c.l.b16 %v646_v29 }
 0x2ee   :  { %v663_v32 = vsel %vm662_vm4, %v661_v52, %v660_v50  ;;  %v800_v52 = vsub.f32 1.0, %v1551_v2 }
 0x2ef   :  { %v664_v33 = vpack.c.b16 %v663_v32, %v663_v32  ;;  %v1225_v32 = vld [vmem:[%s1926_s12] ss:$0 sm:$0xff]  ;;  %s1457_s12 = smov [#allocation6]  }
 0x2f0   :  { %s1171_s24 = sshll.u32 %s1457_s12, 4  ;;  %s1172_s24 = int_to_ptr.vmem [resolvable:$true] %s1171_s24 }
 0x2f1   :  { %1281 = vmatmul.mubr.msk.bf16.vlgmr.msra.gmra.mrb[4].mxu1 %vm319_vm3, %v664_v33  ;;  %s1395_s13 = scalar_lea.vmem %s1172_s24, 16  ;;  %s1399_s25 = scalar_lea.vmem %s1172_s24, 32 }
 0x2f2   :  { %1293 = vmatpush3.bf16.msra.mxu1 %v1349_v53  ;;  %1296 = vmatprep.mubr.msk.bf16.mxu1 %vm1447_vm1, %v1446_v3  ;;  %p1396_p5 = scmp.ne.s32.totalorder %s1172_s24, %s1395_s13  ;;  %p1400_p6 = scmp.lt.s32.totalorder %s1172_s24, %s1172_s24 }
 0x2f3   :  { %1294 = vmatprep.subr.bf16.mxu1 %v1446_v3  ;;  %p1401_p7 = scmp.lt.s32.totalorder %s1399_s25, %s1395_s13 }
 0x2f5   :  { %p1402_p8 = por %p1401_p7, %p1400_p6 }
 0x2f6   :  { %1295 = vmatpush3.bf16.msra.mxu1 %v1350_v22  ;;  %v801_v22 = vsub.f32 1.0, %v1559_v5 }
 0x2f7   :  { %1308 = vmatprep.subr.bf16.mxu1 %v1446_v3  ;;  %p1403_p9 = pnand %p1402_p8, %p1396_p5 }
 0x2f9   :  { %1297 = vmatmul.mubr.msk.bf16.vlgmr.msra.gmra.mrb[8].mxu1 %vm319_vm3, %v848_v25 }
 0x2fa   :  { %1309 = vmatpush3.bf16.msra.mxu1 %v1351_v54  ;;  %1312 = vmatprep.mubr.msk.bf16.mxu1 %vm1447_vm1, %v1446_v3 }
 0x2fb   :  { %1310 = vmatprep.subr.bf16.mxu1 %v1446_v3 }
 0x2fe   :  { %1311 = vmatpush3.bf16.msra.mxu1 %v1352_v20 }
 0x301   :  { %1313 = vmatmul.mubr.msk.bf16.vlgmr.msra.gmra.mrb[12].mxu1 %vm319_vm3, %v1230_v36  ;;  %v1024_v36 = vunpack.c.0.s8 %v1023_v30 }
 0x303   :  { %v1027_v39 = vsub.s32 %v1024_v36, %v1620_v28 }
 0x3c4   :  { %v714_v24 = vpop.f32.mrb[4].mxu1 }
 0x3c5   :  { %v715_v61 = vadd.f32 %v1206_v60, %v714_v24  ;;  %v1282_v62 = vpop.f32.mrb[5].mxu1 }
 0x3c6   :  { %v717_v4 = vpop.f32.mrb[6].mxu1 }
 0x3c7   :  { %1357 = vtanh.f32 %v715_v61  ;;  %v1283_v21 = vpop.f32.mrb[7].mxu1 }
 0x3cc   :  { %v898_v45 = vpop.f32.mrb[8].mxu1 }
 0x3cd   :  { %v1298_v55 = vpop.f32.mrb[9].mxu1 }
 0x3ce   :  { %v901_v7 = vpop.f32.mrb[10].mxu1 }
 0x3cf   :  { %v1299_v34 = vpop.f32.mrb[11].mxu1 }
 0x3d1   :  { %v1358_v59 = vpop.eup %1357 }
 0x3d2   :  { %v721_v35 = vpack.c.bf16 %v1358_v59, %v1358_v59 }
 0x3d4   :  { %1289 = vmatmul.mubr.msk.bf16.vlgmr.msra.gmra.mrb[8].mxu0 %vm319_vm3, %v721_v35  ;;  %v1014_v57 = vpop.f32.mrb[12].mxu1 }
 0x3d5   :  { %1301 = vmatpush3.bf16.msra.mxu0 %v1355_v40  ;;  %v1314_v51 = vpop.f32.mrb[13].mxu1  ;;  %1304 = vmatprep.mubr.msk.bf16.mxu0 %vm1447_vm1, %v1446_v3 }
 0x3d6   :  { %v1017_v10 = vpop.f32.mrb[14].mxu1  ;;  %1302 = vmatprep.subr.bf16.mxu0 %v1446_v3  ;;  %v1226_v51 = vld [vmem:[#allocation2] ss:$0 sm:$0xff] }
 0x3d7   :  { %v1315_v12 = vpop.f32.mrb[15].mxu1 }
 0x3d9   :  { %1303 = vmatpush3.bf16.msra.mxu0 %v1356_v41 }
 0x3dc   :  { %1305 = vmatmul.mubr.msk.bf16.vlgmr.msra.gmra.mrb[12].mxu0 %vm319_vm3, %v664_v33 }
 0x4a7   :  { %v782_v58 = vpop.f32.mrb[8].mxu0 }
 0x4a8   :  { %v783_v13 = vadd.f32 %v1210_v27, %v782_v58  ;;  %v1290_v63 = vpop.f32.mrb[9].mxu0 }
 0x4a9   :  { %v785_v16 = vpop.f32.mrb[10].mxu0 }
 0x4aa   :  { %v788_v0 = vsub.f32 0.0, %v783_v13  ;;  %v1291_v15 = vpop.f32.mrb[11].mxu0 }
 0x4ac   :  { %v789_v17 = vmul.f32 1.442695, %v788_v0 }
 0x4ae   :  { %1359 = vpow2.f32 %v789_v17  ;;  %v1100_v17 = vand.u32 127, %v138_v26  ;;  %v1113_v26 = vsub.f32 1.0, %v1564_v6 }
 0x4af   :  { %v950_v3 = vpop.f32.mrb[12].mxu0 }
 0x4b0   :  { %v951_v37 = vadd.f32 %v950_v3, %v898_v45  ;;  %v1306_v42 = vpop.f32.mrb[13].mxu0  ;;  %v1875_v36 = vsub.s32 %v1100_v17, %v1620_v28 }
 0x4b1   :  { %v953_v46 = vpop.f32.mrb[14].mxu0 }
 0x4b2   :  { %v963_v43 = vadd.f32 %v1220_v18, %v951_v37  ;;  %v1307_v11 = vpop.f32.mrb[15].mxu0 }
 0x4b4   :  { %v1028_v44 = vrot.slane %v963_v43, %v1027_v39 }
 0x4b6   :  { %v1029_v47 = vcombine.high %v1028_v44, %v1028_v44  ;;  %v1036_v1 = vrot.slane %v1028_v44, %v1027_v39 }
 0x4b8   :  { %v1360_v48 = vpop.eup %1359  ;;  %v1043_v8 = vrot.slane %v1029_v47, %v1027_v39  ;;  %v1047_v49 = vrot.slane %v1036_v1, %v1627_v31 }
 0x4b9   :  { %v791_v23 = vadd.f32 1.0, %v1360_v48  ;;  %v1114_v48 = vsub.f32 1.0, %v1573_v9 }
 0x4ba   :  { %v1051_v19 = vrot.slane %v1043_v8, %v1627_v31  ;;  %v1054_v29 = vadd.f32 %v1047_v49, %v1014_v57 }
 0x4bb   :  { %1361 = vrcp.f32 %v791_v23 }
 0x4bc   :  { %v1055_v50 = vadd.f32 %v1051_v19, %v1017_v10  ;;  %1363 = vtanh.f32 %v1054_v29 }
 0x4be   :  { %1365 = vtanh.f32 %v1055_v50 }
 0x4c5   :  { %v1362_v53 = vpop.eup %1361 }
 0x4c6   :  { %v1364_v33 = vpop.eup %1363  ;;  %v795_v54 = vrot.slane %v1362_v53, 1  ;;  %v802_v25 = vsub.f32 1.0, %v1362_v53  ;;  %v798_v31 = vmul.f32 %v1362_v53, %v1551_v2 }
 0x4c7   :  { %v1065_v20 = vmul.f32 %v1364_v33, %v1225_v32 }
 0x4c8   :  { %v1366_v56 = vpop.eup %1365  ;;  %v804_v38 = vrot.slane %v802_v25, 1  ;;  %v807_v60 = vmul.f32 %v802_v25, %v800_v52  ;;  %v799_v62 = vmul.f32 %v795_v54, %v1559_v5 }
 0x4c9   :  { %v1067_v24 = vsel %vm319_vm3, %v1065_v20, 0.0  ;;  %v1066_v61 = vmul.f32 %v1366_v56, %v1225_v32 }
 0x4ca   :  { %1068 = vadd.xlane.f32.xlu1 %v1067_v24  ;;  %v808_v4 = vmul.f32 %v804_v38, %v801_v22  ;;  %v809_v21 = vadd.f32 %v807_v60, %v798_v31 }
 0x4cb   :  { %v1070_v45 = vsel %vm319_vm3, %v1066_v61, 0.0 }
 0x4cc   :  { %1071 = vadd.xlane.f32.xlu0 %v1070_v45  ;;  %v810_v55 = vadd.f32 %v808_v4, %v799_v62  ;;  %v811_v7 = vadd.f32 1e-08, %v809_v21 }
 0x4ce   :  { %v812_v34 = vadd.f32 1e-08, %v810_v55  ;;  %1367 = vlog2.f32 %v811_v7 }
 0x4d0   :  { %1369 = vlog2.f32 %v812_v34 }
 0x4d8   :  { %v1368_v59 = vpop.eup %1367 }
 0x4d9   :  { %v814_v40 = vmul.f32 0.6931472, %v1368_v59 }
 0x4da   :  { %v1370_v2 = vpop.eup %1369 }
 0x4db   :  { %v816_v35 = vmul.f32 0.6931472, %v1370_v2  ;;  %v817_v41 = vsub.f32 0.0, %v814_v40 }
 0x4dd   :  { %v818_v57 = vsub.f32 0.0, %v816_v35 }
 0x4df   :  { %v821_v10 = vrot.slane %v818_v57, 7 }
 0x4e1   :  { %v822_v5 = vsel %vm662_vm4, %v821_v10, %v817_v41 }
 0x4e2   :  { %1080 = vperm.xlu0 %1342, %v1226_v51   ;;  %v825_v12 = vsel %vm824_vm5, %v822_v5, 0.0 }
 0x4e3   :  { %826 = vadd.xlane.f32.xlu1 %v825_v12 }
 0x557   :  { %v1069_v58 = vpop.xlane.xlu1 %1068 }
 0x559   :  { %v1072_v27 = vpop.xlane.xlu0 %1071 }
 0x561   :  { %v1081_v13 = vpop.permute.xlu0 %1080 }
 0x562   :  { %v1083_v63 = vadd.f32 %v1081_v13, %v1069_v58  ;;  %v1084_v14 = vadd.f32 %v1081_v13, %v1072_v27 }
 0x564   :  { %v1085_v30 = vsub.f32 0.0, %v1083_v63  ;;  %v1086_v16 = vsub.f32 0.0, %v1084_v14 }
 0x566   :  { %v1087_v0 = vmul.f32 1.442695, %v1085_v30  ;;  %v1089_v15 = vmul.f32 1.442695, %v1086_v16 }
 0x568   :  { %1371 = vpow2.f32 %v1087_v0 }
 0x569   :  { %1373 = vpow2.f32 %v1089_v15 }
 0x570   :  { %v827_v3 = vpop.xlane.xlu1 %826 }
 0x571   :  { %v1154_v18 = vrot.slane %v827_v3, %v1875_v36 }
 0x572   :  { %v1372_v37 = vpop.eup %1371 }
 0x573   :  { %v1374_v39 = vpop.eup %1373  ;;  %v1091_v42 = vadd.f32 1.0, %v1372_v37  ;;  %1157 = vst.msk [vmem:[#allocation6] sm:$0x1] %vm1156_vm6, %v1154_v18 }
 0x574   :  { %v1092_v46 = vadd.f32 1.0, %v1374_v39 }
 0x575   :  { %1375 = vrcp.f32 %v1091_v42 }
 0x576   :  { %1377 = vrcp.f32 %v1092_v46 }
 0x57f   :  { %v1376_v43 = vpop.eup %1375 }
 0x580   :  { %v1378_v11 = vpop.eup %1377  ;;  %v1104_v44 = vrot.slane %v1376_v43, %v1875_v36  ;;  %v1115_v28 = vsub.f32 1.0, %v1376_v43 }
 0x581   :  { %v1116_v47 = vsub.f32 1.0, %v1378_v11  ;;  %v1108_v1 = vrot.slane %v1378_v11, %v1875_v36 }
 0x582   :  { %v1122_v8 = vrot.slane %v1115_v28, %v1875_v36  ;;  %v1111_v23 = vmul.f32 %v1104_v44, %v1564_v6 }
 0x583   :  { %v1126_v49 = vrot.slane %v1116_v47, %v1875_v36  ;;  %v1112_v29 = vmul.f32 %v1108_v1, %v1573_v9 }
 0x584   :  { %v1129_v19 = vmul.f32 %v1122_v8, %v1113_v26 }
 0x585   :  { %v1130_v50 = vmul.f32 %v1126_v49, %v1114_v48 }
 0x586   :  { %v1131_v52 = vadd.f32 %v1129_v19, %v1111_v23 }
 0x587   :  { %v1132_v32 = vadd.f32 %v1130_v50, %v1112_v29 }
 0x588   :  { %v1133_v53 = vadd.f32 1e-08, %v1131_v52 }
 0x589   :  { %v1134_v33 = vadd.f32 1e-08, %v1132_v32 }
 0x58a   :  { %1379 = vlog2.f32 %v1133_v53 }
 0x58b   :  { %1381 = vlog2.f32 %v1134_v33 }
 0x594   :  { %v1380_v22 = vpop.eup %1379 }
 0x595   :  { %v1382_v54 = vpop.eup %1381  ;;  %v1136_v25 = vmul.f32 0.6931472, %v1380_v22 }
 0x596   :  { %v1138_v20 = vmul.f32 0.6931472, %v1382_v54 }
 0x597   :  { %v1139_v31 = vsub.f32 0.0, %v1136_v25 }
 0x598   :  { %v1140_v56 = vsub.f32 0.0, %v1138_v20 }
 0x59a   :  { %v1143_v38 = vrot.slane %v1140_v56, 7 }
 0x59c   :  { %v1144_v6 = vsel %vm662_vm4, %v1143_v38, %v1139_v31 }
 0x59d   :  { %v1147_v60 = vsel %vm1146_vm7, %v1144_v6, 0.0 }
 0x59e   :  { %1148 = vadd.xlane.f32.xlu1 %v1147_v60 }
 0x59f   :  { %1406 = shalt.err (!%p1403_p9)
}
 0x5a0   :  { %s1407_s5 = scalar_lea.hbm %s1928_s14, 16 }
 0x5a1   :  { %p1408_p10 = scmp.ne.s32.totalorder %s1928_s14, %s1407_s5  ;;  %p1411_p11 = scmp.lt.u32.totalorder %s1407_s5, %s1928_s14 }
 0x5a3   :  { %p1413_p12 = pnand %p1411_p11, %p1408_p10 }
 0x5a5   :  { %1416 = shalt.err (!%p1413_p12)
}
 0x5a6   :  { %1174 = dma.vmem_to_hbm [thread:$0]  %s1172_s24, 16, %s1928_s14, [#allocation4]  }
 0x5a7   :  { %s1458_s0 = smov [#allocation7]  }
 0x5a8   :  { %s1181_s1 = sshll.u32 %s1458_s0, 4  ;;  %s1182_s1 = int_to_ptr.vmem [resolvable:$true] %s1181_s1 }
 0x5a9   :  { %s1417_s17 = scalar_lea.vmem %s1182_s1, 16  ;;  %s1421_s18 = scalar_lea.vmem %s1182_s1, 32 }
 0x5aa   :  { %p1418_p13 = scmp.ne.s32.totalorder %s1182_s1, %s1417_s17  ;;  %p1422_p0 = scmp.lt.s32.totalorder %s1182_s1, %s1182_s1 }
 0x5ab   :  { %p1423_p1 = scmp.lt.s32.totalorder %s1421_s18, %s1417_s17 }
 0x5ad   :  { %p1424_p2 = por %p1423_p1, %p1422_p0 }
 0x5af   :  { %p1425_p3 = pnand %p1424_p2, %p1418_p13 }
 0x62b   :  { %v1149_v9 = vpop.xlane.xlu1 %1148 }
 0x62c   :  { %v1162_v24 = vrot.slane %v1149_v9, %v1875_v36 }
 0x62e   :  { %1164 = vst.msk [vmem:[#allocation7] sm:$0x1] %vm1156_vm6, %v1162_v24 }
 0x62f   :  { %1428 = shalt.err (!%p1425_p3)
}
 0x630   :  { %s1429_s14 = scalar_lea.hbm %s1929_s15, 16 }
 0x631   :  { %p1430_p4 = scmp.ne.s32.totalorder %s1929_s15, %s1429_s14  ;;  %p1433_p5 = scmp.lt.u32.totalorder %s1429_s14, %s1929_s15 }
 0x633   :  { %p1435_p6 = pnand %p1433_p5, %p1430_p4 }
 0x635   :  { %1438 = shalt.err (!%p1435_p6)
}
 0x636   :  { %1184 = dma.vmem_to_hbm [thread:$0]  %s1182_s1, 16, %s1929_s15, [#allocation8]  }
 0x637   :  { %1441 = dma.done.wait [#allocation4], 16  }
 0x638   :  { %1442 = vsyncadd [#allocation4], 4294967280 }
 0x639   :  { %1443 = dma.done.wait [#allocation8], 16  }
 0x63a   :  { %1444 = vsyncadd [#allocation8], 4294967280 }
 0x63b   :  { %1191 = vsyncpa [#allocation4], 1 }
 0x63c   :  { %1192 = vsyncpa [#allocation8], 1 }
 0x63d   :  { %1193 = vsyncpa [#allocation5], 1 }

</bundles_post_ra>
